<compile_context>
chip_gen: v7x
topology: tpu7x:2x2x1
jax: 0.10.0
libtpu: 0.0.40
codegen_flags: <defaults>
</compile_context>

<pallas_src>
import jax
import jax.numpy as jnp
from jax.experimental import pallas as pl
from jax.experimental.pallas import tpu as pltpu

LANES = 128                      # pad conv output channels to full lane width
_VMEM = pl.BlockSpec(memory_space=pltpu.MemorySpace.VMEM)
_COMPILER_PARAMS = pltpu.CompilerParams(
    dimension_semantics=("parallel",),
    vmem_limit_bytes=32 * 1024 * 1024,
)


# ----------------------------- Pallas kernels ------------------------------

def _conv3x3_bn_relu_kernel(x_ref, w_ref, shift_ref, o_ref):
    """3x3 conv (stride 1, pad 1) + folded-BN shift + ReLU for one image.

    x_ref:     [1, H+2, W+2, Cin]  bf16 (spatially pre-padded)
    w_ref:     [9, Cin, Cout]      bf16 (BN scale already folded in)
    shift_ref: [1, Cout]           f32  (padded channels have shift 0)
    o_ref:     [1, H, W, Cout]     bf16
    """
    H, W, Cout = o_ref.shape[1], o_ref.shape[2], o_ref.shape[3]
    Cin = x_ref.shape[3]
    xt = x_ref[0]                                   # [H+2, W+2, Cin]
    acc = jnp.zeros((H * W, Cout), jnp.float32)
    for di in range(3):                             # 9 accumulated MXU matmuls
        for dj in range(3):
            patch = xt[di:di + H, dj:dj + W, :].reshape(H * W, Cin)
            acc += jnp.dot(patch, w_ref[di * 3 + dj],
                           preferred_element_type=jnp.float32)
    y = jnp.maximum(acc + shift_ref[...], 0.0)      # f32 epilogue
    o_ref[...] = y.reshape(1, H, W, Cout).astype(o_ref.dtype)


def _head_proj_kernel(x_ref, wh_ref, shift_ref, wp_ref, bp_ref, o_ref):
    """Fused avgpool + last_linear (BN scale folded) + last_bn shift
    + L2 normalize + projection Linear."""
    pooled = jnp.mean(x_ref[...].astype(jnp.float32), axis=1)        # [B, C]
    feat = (jnp.dot(pooled, wh_ref[...], preferred_element_type=jnp.float32)
            + shift_ref[...])                                        # [B, 512]
    sumsq = jnp.sum(feat * feat, axis=-1, keepdims=True)
    inv = jax.lax.rsqrt(jnp.maximum(sumsq, 1e-24))   # == 1 / max(||x||, 1e-12)
    emb = feat * inv
    o_ref[...] = (jnp.dot(emb, wp_ref[...], preferred_element_type=jnp.float32)
                  + bp_ref[...])


def _head_kernel(x_ref, wh_ref, shift_ref, o_ref):
    """Fused avgpool + last_linear + last_bn + L2 normalize (no projection)."""
    pooled = jnp.mean(x_ref[...].astype(jnp.float32), axis=1)
    feat = (jnp.dot(pooled, wh_ref[...], preferred_element_type=jnp.float32)
            + shift_ref[...])
    sumsq = jnp.sum(feat * feat, axis=-1, keepdims=True)
    o_ref[...] = feat * jax.lax.rsqrt(jnp.maximum(sumsq, 1e-24))


# ----------------------------- pallas_call wrappers -------------------------

def pallas_conv3x3_bn_relu(x_padded, w, shift, H, W):
    """x_padded: [B, H+2, W+2, Cin] bf16; w: [9, Cin, Cout] bf16; shift: [1, Cout] f32."""
    B, Hp2, Wp2, Cin = x_padded.shape
    Cout = w.shape[-1]
    return pl.pallas_call(
        _conv3x3_bn_relu_kernel,
        out_shape=jax.ShapeDtypeStruct((B, H, W, Cout), jnp.bfloat16),
        grid_spec=pltpu.PrefetchScalarGridSpec(
            num_scalar_prefetch=0,
            grid=(B,),
            in_specs=[
                pl.BlockSpec((1, Hp2, Wp2, Cin), lambda b: (b, 0, 0, 0)),
                pl.BlockSpec((9, Cin, Cout), lambda b: (0, 0, 0)),   # resident
                pl.BlockSpec((1, Cout), lambda b: (0, 0)),            # resident
            ],
            out_specs=pl.BlockSpec((1, H, W, Cout), lambda b: (b, 0, 0, 0)),
        ),
        compiler_params=_COMPILER_PARAMS,
    )(x_padded, w, shift)


def pallas_head(y, wh, shift):
    B = y.shape[0]
    N = wh.shape[1]
    return pl.pallas_call(
        _head_kernel,
        out_shape=jax.ShapeDtypeStruct((B, N), jnp.float32),
        in_specs=[_VMEM, _VMEM, _VMEM],
        out_specs=_VMEM,
    )(y, wh.astype(jnp.float32), shift.reshape(1, N).astype(jnp.float32))


def pallas_head_proj(y, wh, shift, wp, bp):
    B = y.shape[0]
    N = wh.shape[1]
    E = wp.shape[1]
    return pl.pallas_call(
        _head_proj_kernel,
        out_shape=jax.ShapeDtypeStruct((B, E), jnp.float32),
        in_specs=[_VMEM, _VMEM, _VMEM, _VMEM, _VMEM],
        out_specs=_VMEM,
    )(y, wh.astype(jnp.float32), shift.reshape(1, N).astype(jnp.float32),
      wp.astype(jnp.float32), bp.reshape(1, E).astype(jnp.float32))


# ----------------------------- glue (plain JAX, constants only) -------------

def fold_bn(gamma, beta, mean, var, eps=1e-3):
    scale = gamma / jnp.sqrt(var + eps)
    shift = beta - mean * scale
    return scale, shift


def prepare_conv(w_hwio, gamma, beta, mean, var, cin_pad, cout_pad, eps=1e-3):
    """Fold BN scale into the conv weight, pad Cin/Cout, cast bf16."""
    scale, shift = fold_bn(gamma, beta, mean, var, eps)
    w = w_hwio * scale[None, None, None, :]
    _, _, cin, cout = w.shape
    w = jnp.pad(w, ((0, 0), (0, 0), (0, cin_pad - cin), (0, cout_pad - cout)))
    shift = jnp.pad(shift, (0, cout_pad - cout))       # padded shift = 0 -> ReLU keeps 0
    return (w.reshape(9, cin_pad, cout_pad).astype(jnp.bfloat16),
            shift.reshape(1, cout_pad).astype(jnp.float32))


def init_params(key, cin=3, c1=16, c2=32, feat_dim=512, embedding_size=128):
    ks = jax.random.split(key, 12)
    n = jax.random.normal
    p = {}
    p["conv1_w"] = 0.1 * n(ks[0], (3, 3, cin, c1), jnp.float32)
    p["bn1"] = (1.0 + 0.05 * n(ks[1], (c1,), jnp.float32),
                0.05 * n(ks[2], (c1,), jnp.float32),
                0.05 * n(ks[3], (c1,), jnp.float32),
                1.0 + 0.1 * jnp.abs(n(ks[4], (c1,), jnp.float32)))
    p["conv2_w"] = 0.1 * n(ks[5], (3, 3, c1, c2), jnp.float32)
    p["bn2"] = (1.0 + 0.05 * n(ks[6], (c2,), jnp.float32),
                0.05 * n(ks[7], (c2,), jnp.float32),
                0.05 * n(ks[8], (c2,), jnp.float32),
                1.0 + 0.1 * jnp.abs(n(ks[9], (c2,), jnp.float32)))
    p["last_w"] = 0.1 * n(ks[10], (c2, feat_dim), jnp.float32)   # Linear(c2, 512, bias=False)
    kb = jax.random.split(ks[11], 6)
    p["lastbn"] = (1.0 + 0.05 * n(kb[0], (feat_dim,), jnp.float32),
                   0.05 * n(kb[1], (feat_dim,), jnp.float32),
                   0.05 * n(kb[2], (feat_dim,), jnp.float32),
                   1.0 + 0.1 * jnp.abs(n(kb[3], (feat_dim,), jnp.float32)))
    if embedding_size != 512:
        p["proj_w"] = 0.1 * n(kb[4], (feat_dim, embedding_size), jnp.float32)
        p["proj_b"] = 0.05 * n(kb[5], (embedding_size,), jnp.float32)
    return p


def face_encoder_forward(x_nchw, params, embedding_size=128):
    """x_nchw: [B, C, H, W] float32 -> embeddings [B, embedding_size]."""
    x = jnp.transpose(x_nchw, (0, 2, 3, 1)).astype(jnp.float32)   # NHWC
    B, H, W, Cin = x.shape
    c2 = params["last_w"].shape[0]
    cin1 = ((Cin + 7) // 8) * 8                                   # sublane-align first K

    # conv stem (BasicConv2d: conv(no bias) + BN(eval) + ReLU) -> Pallas conv kernels
    w1, sh1 = prepare_conv(params["conv1_w"], *params["bn1"],
                           cin_pad=cin1, cout_pad=LANES)
    w2, sh2 = prepare_conv(params["conv2_w"], *params["bn2"],
                           cin_pad=LANES, cout_pad=LANES)

    xp = jnp.pad(x, ((0, 0), (1, 1), (1, 1), (0, cin1 - Cin))).astype(jnp.bfloat16)
    y1 = pallas_conv3x3_bn_relu(xp, w1, sh1, H, W)                # [B, H, W, 128] bf16
    y1p = jnp.pad(y1, ((0, 0), (1, 1), (1, 1), (0, 0)))
    y2 = pallas_conv3x3_bn_relu(y1p, w2, sh2, H, W)               # [B, H, W, 128] bf16

    # fused head: avgpool_1a + last_linear + last_bn + L2 normalize (+ projection)
    sL, bL = fold_bn(*params["lastbn"])
    wh = params["last_w"] * sL[None, :]                           # fold BN scale into W
    wh = jnp.pad(wh, ((0, LANES - c2), (0, 0)))                   # zero rows for padded ch.
    y2_flat = y2.reshape(B, H * W, LANES)
    if embedding_size != 512:
        return pallas_head_proj(y2_flat, wh, bL, params["proj_w"], params["proj_b"])
    return pallas_head(y2_flat, wh, bL)


# ----------------------------- pure-jnp reference ---------------------------

def _conv3x3_ref(x, w):
    B, H, W, _ = x.shape
    xp = jnp.pad(x, ((0, 0), (1, 1), (1, 1), (0, 0)))
    out = jnp.zeros((B, H, W, w.shape[-1]), jnp.float32)
    for di in range(3):
        for dj in range(3):
            out = out + jnp.einsum("bhwc,cd->bhwd",
                                   xp[:, di:di + H, dj:dj + W, :], w[di, dj])
    return out


def reference_forward(x_nchw, params, embedding_size=128):
    x = jnp.transpose(x_nchw, (0, 2, 3, 1)).astype(jnp.float32)
    s1, b1 = fold_bn(*params["bn1"])
    y1 = jnp.maximum(_conv3x3_ref(x, params["conv1_w"]) * s1 + b1, 0.0)
    s2, b2 = fold_bn(*params["bn2"])
    y2 = jnp.maximum(_conv3x3_ref(y1, params["conv2_w"]) * s2 + b2, 0.0)
    pooled = jnp.mean(y2, axis=(1, 2))
    sL, bL = fold_bn(*params["lastbn"])
    feat = pooled @ params["last_w"] * sL + bL
    norm = jnp.sqrt(jnp.sum(feat * feat, axis=-1, keepdims=True))
    emb = feat / jnp.maximum(norm, 1e-12)
    if embedding_size != 512:
        emb = emb @ params["proj_w"] + params["proj_b"]
    return emb


if __name__ == "__main__":
    key = jax.random.PRNGKey(0)
    k_x, k_p = jax.random.split(key)

    B, C, H, W = 2, 3, 16, 16
    embedding_size = 128          # != 512, so the projection Linear path is exercised
    x = jax.random.normal(k_x, (B, C, H, W), jnp.float32)

    params = init_params(k_p, cin=C, embedding_size=embedding_size)

    out = face_encoder_forward(x, params, embedding_size)
    out = jax.block_until_ready(out)

    ref = reference_forward(x, params, embedding_size)
    assert out.shape == (B, embedding_size), out.shape
    # bf16 activations / weights with f32 accumulate -> looser tolerance vs f32 ref.
    assert jnp.allclose(out, ref, atol=2e-2, rtol=2e-2), "mismatch vs jnp reference"

    print("KERNEL_OK")
</pallas_src>

<mosaic_0001>
module attributes {stable_mosaic.version = 11 : i64} {
  func.func @_conv3x3_bn_relu_kernel(%arg0: i32, %arg1: memref<1x18x18x8xbf16, #tpu.memory_space<vmem>>, %arg2: memref<9x8x128xbf16, #tpu.memory_space<vmem>>, %arg3: memref<1x128xf32, #tpu.memory_space<vmem>>, %arg4: memref<1x16x16x128xbf16, #tpu.memory_space<vmem>>) attributes {dimension_semantics = [#tpu.dimension_semantics<parallel>], iteration_bounds = array<i64: 2>, scalar_prefetch = 0 : i64, scratch_operands = 0 : i64, tpu.core_type = #tpu.core_type<tc>, window_params = [{transform_indices = @transform_0, window_bounds = array<i64: 1, 18, 18, 8>}, {pipeline_mode = #tpu.pipeline_mode<synchronous>, transform_indices = @transform_1, window_bounds = array<i64: 9, 8, 128>}, {pipeline_mode = #tpu.pipeline_mode<synchronous>, transform_indices = @transform_2, window_bounds = array<i64: 1, 128>}, {transform_indices = @transform_3, window_bounds = array<i64: 1, 16, 16, 128>}]} {
    %c0 = arith.constant 0 : index
    %c0_0 = arith.constant 0 : index
    %c0_1 = arith.constant 0 : index
    %c0_2 = arith.constant 0 : index
    %0 = vector.load %arg1[%c0, %c0_0, %c0_1, %c0_2] : memref<1x18x18x8xbf16, #tpu.memory_space<vmem>>, vector<1x18x18x8xbf16>
    %1 = vector.shape_cast %0 : vector<1x18x18x8xbf16> to vector<18x18x8xbf16>
    %cst = arith.constant 0.000000e+00 : f32
    %2 = vector.broadcast %cst : f32 to vector<256x128xf32>
    %3 = vector.extract_strided_slice %1 {offsets = [0, 0, 0], sizes = [16, 16, 8], strides = [1, 1, 1]} : vector<18x18x8xbf16> to vector<16x16x8xbf16>
    %4 = vector.shape_cast %3 : vector<16x16x8xbf16> to vector<256x8xbf16>
    %c0_3 = arith.constant 0 : index
    %c0_4 = arith.constant 0 : index
    %c0_5 = arith.constant 0 : index
    %5 = vector.load %arg2[%c0_3, %c0_4, %c0_5] : memref<9x8x128xbf16, #tpu.memory_space<vmem>>, vector<1x8x128xbf16>
    %6 = vector.shape_cast %5 : vector<1x8x128xbf16> to vector<8x128xbf16>
    %cst_6 = arith.constant dense<0.000000e+00> : vector<256x128xf32>
    %7 = tpu.matmul %4, %6, %cst_6 {dimension_numbers = #tpu.dot_dimension_numbers<[1], [0], [0], [1], [0, 0, 1, 1], [], []>} : vector<256x8xbf16>, vector<8x128xbf16>, vector<256x128xf32> -> vector<256x128xf32>
    %8 = arith.addf %2, %7 : vector<256x128xf32>
    %9 = vector.extract_strided_slice %1 {offsets = [0, 1, 0], sizes = [16, 16, 8], strides = [1, 1, 1]} : vector<18x18x8xbf16> to vector<16x16x8xbf16>
    %10 = vector.shape_cast %9 : vector<16x16x8xbf16> to vector<256x8xbf16>
    %c1 = arith.constant 1 : index
    %c0_7 = arith.constant 0 : index
    %c0_8 = arith.constant 0 : index
    %11 = vector.load %arg2[%c1, %c0_7, %c0_8] : memref<9x8x128xbf16, #tpu.memory_space<vmem>>, vector<1x8x128xbf16>
    %12 = vector.shape_cast %11 : vector<1x8x128xbf16> to vector<8x128xbf16>
    %cst_9 = arith.constant dense<0.000000e+00> : vector<256x128xf32>
    %13 = tpu.matmul %10, %12, %cst_9 {dimension_numbers = #tpu.dot_dimension_numbers<[1], [0], [0], [1], [0, 0, 1, 1], [], []>} : vector<256x8xbf16>, vector<8x128xbf16>, vector<256x128xf32> -> vector<256x128xf32>
    %14 = arith.addf %8, %13 : vector<256x128xf32>
    %15 = vector.extract_strided_slice %1 {offsets = [0, 2, 0], sizes = [16, 16, 8], strides = [1, 1, 1]} : vector<18x18x8xbf16> to vector<16x16x8xbf16>
    %16 = vector.shape_cast %15 : vector<16x16x8xbf16> to vector<256x8xbf16>
    %c2 = arith.constant 2 : index
    %c0_10 = arith.constant 0 : index
    %c0_11 = arith.constant 0 : index
    %17 = vector.load %arg2[%c2, %c0_10, %c0_11] : memref<9x8x128xbf16, #tpu.memory_space<vmem>>, vector<1x8x128xbf16>
    %18 = vector.shape_cast %17 : vector<1x8x128xbf16> to vector<8x128xbf16>
    %cst_12 = arith.constant dense<0.000000e+00> : vector<256x128xf32>
    %19 = tpu.matmul %16, %18, %cst_12 {dimension_numbers = #tpu.dot_dimension_numbers<[1], [0], [0], [1], [0, 0, 1, 1], [], []>} : vector<256x8xbf16>, vector<8x128xbf16>, vector<256x128xf32> -> vector<256x128xf32>
    %20 = arith.addf %14, %19 : vector<256x128xf32>
    %21 = vector.extract_strided_slice %1 {offsets = [1, 0, 0], sizes = [16, 16, 8], strides = [1, 1, 1]} : vector<18x18x8xbf16> to vector<16x16x8xbf16>
    %22 = vector.shape_cast %21 : vector<16x16x8xbf16> to vector<256x8xbf16>
    %c3 = arith.constant 3 : index
    %c0_13 = arith.constant 0 : index
    %c0_14 = arith.constant 0 : index
    %23 = vector.load %arg2[%c3, %c0_13, %c0_14] : memref<9x8x128xbf16, #tpu.memory_space<vmem>>, vector<1x8x128xbf16>
    %24 = vector.shape_cast %23 : vector<1x8x128xbf16> to vector<8x128xbf16>
    %cst_15 = arith.constant dense<0.000000e+00> : vector<256x128xf32>
    %25 = tpu.matmul %22, %24, %cst_15 {dimension_numbers = #tpu.dot_dimension_numbers<[1], [0], [0], [1], [0, 0, 1, 1], [], []>} : vector<256x8xbf16>, vector<8x128xbf16>, vector<256x128xf32> -> vector<256x128xf32>
    %26 = arith.addf %20, %25 : vector<256x128xf32>
    %27 = vector.extract_strided_slice %1 {offsets = [1, 1, 0], sizes = [16, 16, 8], strides = [1, 1, 1]} : vector<18x18x8xbf16> to vector<16x16x8xbf16>
    %28 = vector.shape_cast %27 : vector<16x16x8xbf16> to vector<256x8xbf16>
    %c4 = arith.constant 4 : index
    %c0_16 = arith.constant 0 : index
    %c0_17 = arith.constant 0 : index
    %29 = vector.load %arg2[%c4, %c0_16, %c0_17] : memref<9x8x128xbf16, #tpu.memory_space<vmem>>, vector<1x8x128xbf16>
    %30 = vector.shape_cast %29 : vector<1x8x128xbf16> to vector<8x128xbf16>
    %cst_18 = arith.constant dense<0.000000e+00> : vector<256x128xf32>
    %31 = tpu.matmul %28, %30, %cst_18 {dimension_numbers = #tpu.dot_dimension_numbers<[1], [0], [0], [1], [0, 0, 1, 1], [], []>} : vector<256x8xbf16>, vector<8x128xbf16>, vector<256x128xf32> -> vector<256x128xf32>
    %32 = arith.addf %26, %31 : vector<256x128xf32>
    %33 = vector.extract_strided_slice %1 {offsets = [1, 2, 0], sizes = [16, 16, 8], strides = [1, 1, 1]} : vector<18x18x8xbf16> to vector<16x16x8xbf16>
    %34 = vector.shape_cast %33 : vector<16x16x8xbf16> to vector<256x8xbf16>
    %c5 = arith.constant 5 : index
    %c0_19 = arith.constant 0 : index
    %c0_20 = arith.constant 0 : index
    %35 = vector.load %arg2[%c5, %c0_19, %c0_20] : memref<9x8x128xbf16, #tpu.memory_space<vmem>>, vector<1x8x128xbf16>
    %36 = vector.shape_cast %35 : vector<1x8x128xbf16> to vector<8x128xbf16>
    %cst_21 = arith.constant dense<0.000000e+00> : vector<256x128xf32>
    %37 = tpu.matmul %34, %36, %cst_21 {dimension_numbers = #tpu.dot_dimension_numbers<[1], [0], [0], [1], [0, 0, 1, 1], [], []>} : vector<256x8xbf16>, vector<8x128xbf16>, vector<256x128xf32> -> vector<256x128xf32>
    %38 = arith.addf %32, %37 : vector<256x128xf32>
    %39 = vector.extract_strided_slice %1 {offsets = [2, 0, 0], sizes = [16, 16, 8], strides = [1, 1, 1]} : vector<18x18x8xbf16> to vector<16x16x8xbf16>
    %40 = vector.shape_cast %39 : vector<16x16x8xbf16> to vector<256x8xbf16>
    %c6 = arith.constant 6 : index
    %c0_22 = arith.constant 0 : index
    %c0_23 = arith.constant 0 : index
    %41 = vector.load %arg2[%c6, %c0_22, %c0_23] : memref<9x8x128xbf16, #tpu.memory_space<vmem>>, vector<1x8x128xbf16>
    %42 = vector.shape_cast %41 : vector<1x8x128xbf16> to vector<8x128xbf16>
    %cst_24 = arith.constant dense<0.000000e+00> : vector<256x128xf32>
    %43 = tpu.matmul %40, %42, %cst_24 {dimension_numbers = #tpu.dot_dimension_numbers<[1], [0], [0], [1], [0, 0, 1, 1], [], []>} : vector<256x8xbf16>, vector<8x128xbf16>, vector<256x128xf32> -> vector<256x128xf32>
    %44 = arith.addf %38, %43 : vector<256x128xf32>
    %45 = vector.extract_strided_slice %1 {offsets = [2, 1, 0], sizes = [16, 16, 8], strides = [1, 1, 1]} : vector<18x18x8xbf16> to vector<16x16x8xbf16>
    %46 = vector.shape_cast %45 : vector<16x16x8xbf16> to vector<256x8xbf16>
    %c7 = arith.constant 7 : index
    %c0_25 = arith.constant 0 : index
    %c0_26 = arith.constant 0 : index
    %47 = vector.load %arg2[%c7, %c0_25, %c0_26] : memref<9x8x128xbf16, #tpu.memory_space<vmem>>, vector<1x8x128xbf16>
    %48 = vector.shape_cast %47 : vector<1x8x128xbf16> to vector<8x128xbf16>
    %cst_27 = arith.constant dense<0.000000e+00> : vector<256x128xf32>
    %49 = tpu.matmul %46, %48, %cst_27 {dimension_numbers = #tpu.dot_dimension_numbers<[1], [0], [0], [1], [0, 0, 1, 1], [], []>} : vector<256x8xbf16>, vector<8x128xbf16>, vector<256x128xf32> -> vector<256x128xf32>
    %50 = arith.addf %44, %49 : vector<256x128xf32>
    %51 = vector.extract_strided_slice %1 {offsets = [2, 2, 0], sizes = [16, 16, 8], strides = [1, 1, 1]} : vector<18x18x8xbf16> to vector<16x16x8xbf16>
    %52 = vector.shape_cast %51 : vector<16x16x8xbf16> to vector<256x8xbf16>
    %c8 = arith.constant 8 : index
    %c0_28 = arith.constant 0 : index
    %c0_29 = arith.constant 0 : index
    %53 = vector.load %arg2[%c8, %c0_28, %c0_29] : memref<9x8x128xbf16, #tpu.memory_space<vmem>>, vector<1x8x128xbf16>
    %54 = vector.shape_cast %53 : vector<1x8x128xbf16> to vector<8x128xbf16>
    %cst_30 = arith.constant dense<0.000000e+00> : vector<256x128xf32>
    %55 = tpu.matmul %52, %54, %cst_30 {dimension_numbers = #tpu.dot_dimension_numbers<[1], [0], [0], [1], [0, 0, 1, 1], [], []>} : vector<256x8xbf16>, vector<8x128xbf16>, vector<256x128xf32> -> vector<256x128xf32>
    %56 = arith.addf %50, %55 : vector<256x128xf32>
    %c0_31 = arith.constant 0 : index
    %c0_32 = arith.constant 0 : index
    %57 = vector.load %arg3[%c0_31, %c0_32] : memref<1x128xf32, #tpu.memory_space<vmem>>, vector<1x128xf32>
    %58 = vector.broadcast %57 : vector<1x128xf32> to vector<256x128xf32>
    %59 = arith.addf %56, %58 : vector<256x128xf32>
    %cst_33 = arith.constant 0.000000e+00 : f32
    %60 = vector.broadcast %cst_33 : f32 to vector<256x128xf32>
    %61 = arith.maximumf %59, %60 : vector<256x128xf32>
    %62 = vector.shape_cast %61 : vector<256x128xf32> to vector<1x16x16x128xf32>
    %63 = arith.truncf %62 : vector<1x16x16x128xf32> to vector<1x16x16x128xbf16>
    %c0_34 = arith.constant 0 : index
    %c0_35 = arith.constant 0 : index
    %c0_36 = arith.constant 0 : index
    %c0_37 = arith.constant 0 : index
    %64 = vector.load %arg4[%c0_34, %c0_35, %c0_36, %c0_37] : memref<1x16x16x128xbf16, #tpu.memory_space<vmem>>, vector<1x16x16x128xbf16>
    tpu.vector_store %arg4[%c0_34, %c0_35, %c0_36, %c0_37], %63 {strides = array<i32>} : memref<1x16x16x128xbf16, #tpu.memory_space<vmem>>, vector<1x16x16x128xbf16>,
    return
  }
  func.func @transform_0(%arg0: i32) -> (i32, i32, i32, i32) {
    %c0_i32 = arith.constant 0 : i32
    %c0_i32_0 = arith.constant 0 : i32
    %c0_i32_1 = arith.constant 0 : i32
    %c0_i32_2 = arith.constant 0 : i32
    return %arg0, %c0_i32, %c0_i32_0, %c0_i32_1 : i32, i32, i32, i32
  }
  func.func @transform_1(%arg0: i32) -> (i32, i32, i32) {
    %c0_i32 = arith.constant 0 : i32
    %c0_i32_0 = arith.constant 0 : i32
    %c0_i32_1 = arith.constant 0 : i32
    %c0_i32_2 = arith.constant 0 : i32
    return %c0_i32, %c0_i32_0, %c0_i32_1 : i32, i32, i32
  }
  func.func @transform_2(%arg0: i32) -> (i32, i32) {
    %c0_i32 = arith.constant 0 : i32
    %c0_i32_0 = arith.constant 0 : i32
    %c0_i32_1 = arith.constant 0 : i32
    return %c0_i32, %c0_i32_0 : i32, i32
  }
  func.func @transform_3(%arg0: i32) -> (i32, i32, i32, i32) {
    %c0_i32 = arith.constant 0 : i32
    %c0_i32_0 = arith.constant 0 : i32
    %c0_i32_1 = arith.constant 0 : i32
    %c0_i32_2 = arith.constant 0 : i32
    return %arg0, %c0_i32, %c0_i32_0, %c0_i32_1 : i32, i32, i32, i32
  }
}

</mosaic_0001>

<bundles_post_ra>
// kernel: tpu_custom_call.1
= control target key start
LH: loop header
LB: loop body
LE: loop exit
PB: predicated region body
PF: predicated region fallthrough
CT: control target
= control target key end

     0   :  { %8 = vsyncpa [#allocation3], 0  ;;  %s5590_s0 = inlined_call_operand.vmem [shape: bf16[2,18,18,8], index: 0, kind: input, shape index: {}]   ;;  %s5591_s1 = inlined_call_operand.vmem [shape: bf16[9,8,128], index: 1, kind: input, shape index: {}]   ;;  %s5592_s2 = inlined_call_operand.vmem [shape: f32[1,128], index: 2, kind: input, shape index: {}]   ;;  %s5593_s3 = inlined_call_operand.hbm [shape: bf16[2,16,16,128], index: 3, kind: output, shape index: {}]  }
   0x1   :  { %10 = vsyncpa [#allocation3 + $0x1], 0  ;;  %s4466_s12 = smov 0   ;;  %s4468_s13 = smov 0  }
   0x2   :  { %s4470_s14 = smov 0   ;;  %s4472_s15 = smov 0  }
   0x3 LB: > { %s4487_s16 = sadd.s32 4294967295, %s4441_s15   ;;  %s3192_s17 = sadd.s32 4294967294, %s4441_s15   ;;  %s4441_s15 = sphi %s4472_s15, %s5676_s15   ;;  %s4437_s14 = sphi %s4470_s14, %s5675_s14   ;;  %s4433_s13 = sphi %s4468_s13, %s5674_s13   ;;  %s4429_s12 = sphi %s4466_s12, %s5673_s12  }
   0x4   : > { %s4491_s18 = sadd.s32 1, %s4441_s15   ;;  %s91_s19 = sadd.s32 1, %s4437_s14 }
   0x5   : > { %s88_s20 = ssub.s32 %s4441_s15, %s4491_s18  ;;  %p101_p0 = scmp.ne.s32.totalorder %s4437_s14, %s4433_s13 }
   0x6   : > { %p89_p1 = scmp.eq.s32.totalorder %s88_s20, 0  ;;  %p102_p2 = scmp.eq.s32.totalorder %s4487_s16, 1 }
   0x7   : > { %p107_p3 = scmp.ne.s32.totalorder %s4433_s13, %s4429_s12  ;;  %p108_p4 = scmp.eq.s32.totalorder %s3192_s17, 1 }
   0x8   : > { %s4502_s21 = scalar_select %p89_p1, %s4437_s14, %s91_s19  }
   0x9   : > { %p4504_p5 = por %p102_p2, %p101_p0  ;;  %p4508_p6 = por %p108_p4, %p107_p3 }
   0xa   : > { %p3195_p7 = scmp.ge.s32.totalorder %s4441_s15, 1  ;;  %p140_p8 = scmp.lt.s32.totalorder %s4441_s15, 3 }
   0xc   : > { %p141_p9 = pnand %p3195_p7, %p140_p8 }
   0xe   : > { %144 = sbr.rel (%p141_p9) target bundleno = 578 (0x242), region = 32 }
  0x15   : > { %v3198_v0 = vld [vmem:[%s5591_s1 + $0x4] sm:$0xf]  ;;  %vm711_vm0 = vcmask 1043456   ;;  %v3330_v1 = vld [vmem:[%s5591_s1 + $0x10] sm:$0xf]  ;;  %p164_p10 = scmp.lt.s32.totalorder %s4487_s16, 1 }
  0x16   : > { %4305 = vmatprep.subr.msk.bf16.mxu1 %vm711_vm0, %v3198_v0  ;;  %4309 = vmatprep.subr.msk.bf16.mxu0 %vm711_vm0, %v3330_v1  ;;  %v713_v2 = vsel %vm711_vm0, %v3198_v0, 0  ;;  %v4525_v3 = vsel %vm711_vm0, %v3330_v1, 0  ;;  %v224_v4 = vld [vmem:[%s5591_s1] sm:$0xf]  ;;  %v3349_v5 = vld [vmem:[%s5591_s1 + $0x14] sm:$0xf] }
  0x17   : > { %5627 = vst [vmem:[#allocation5_spill] sm:$0xff] %v4525_v3  ;;  %3742 = vmatpush3.bf16.msra.mxu1 %v713_v2  ;;  %3878 = vmatpush3.bf16.msra.mxu0 %v4525_v3  ;;  %s165_s28 = scalar_select %p164_p10, %s4487_s16, 1  ;;  %vm225_vm1 = vsmask.f32 3328  ;;  %vm226_vm2 = vsmask.f32 7440 }
  0x18   : > { %4306 = vmatprep.subr.msk.bf16.mxu1 %vm711_vm0, %v224_v4  ;;  %4311 = vmatprep.subr.msk.bf16.mxu0 %vm711_vm0, %v3349_v5  ;;  %v4543_v6 = vsel %vm711_vm0, %v224_v4, 0  ;;  %v4546_v7 = vsel %vm711_vm0, %v3349_v5, 0  ;;  %v4551_v8 = vld [vmem:[%s5591_s1 + $0x18] sm:$0xf]  ;;  %vm662_vm3 = vcmask 64512   ;;  %vm4587_vm4 = vmor %vm225_vm1, %vm226_vm2  ;;  %vm1184_vm5 = vcmask 1042432  }
  0x19   : > { %s4315_s6 = smul.u32 216, %s165_s28  ;;  %v4575_v20 = vsel %vm711_vm0, %v4551_v8, 0  ;;  %vm1185_vm6 = vcmask 1046532   ;;  %s4443_s24 = smov [#allocation2]  }
  0x1a   : > { %vm4768_vm7 = vmor %vm1184_vm5, %vm1185_vm6  ;;  %s4383_s25 = sshll.u32 %s4443_s24, 4  ;;  %s4384_s25 = int_to_ptr.vmem [resolvable:$false] %s4383_s25 }
  0x1b   : > { %s4540_s9 = scalar_lea.vmem %s5590_s0, %s4315_s6  ;;  %s161_s6 = sand.u32 1, %s4433_s13  }
  0x1c   : > { %v4554_v9 = vld [vmem:[%s4540_s9] sm:$0xf]  ;;  %v4557_v10 = vld [vmem:[%s4540_s9 + $0x4] sm:$0xf]  ;;  %v172_v11 = vld [vmem:[%s4540_s9 + $0x8] sm:$0x1] }
  0x1d   : > { %v229_v12 = vshrl.u32 %v4554_v9, 16  ;;  %v232_v13 = vshll.u32 %v4554_v9, 16  ;;  %v238_v14 = vshll.u32 %v4557_v10, 16  ;;  %v242_v15 = vshrl.u32 %v4557_v10, 16  ;;  %v4565_v16 = vld [vmem:[%s4540_s9 + $0xc] sm:$0xf] }
  0x1e   : > { %v248_v17 = vshll.u32 %v172_v11, 16  ;;  %v4568_v18 = vld [vmem:[%s4540_s9 + $0x10] sm:$0xf]  ;;  %v4571_v19 = vld [vmem:[%s4540_s9 + $0x14] sm:$0x1]  ;;  %v253_v26 = vshrl.u32 %v4565_v16, 16 }
  0x1f   : > { %v231_v21 = vrot.slane %v229_v12, 4  ;;  %v234_v22 = vrot.slane %v232_v13, 5  ;;  %v240_v23 = vrot.slane %v238_v14, 5  ;;  %v244_v24 = vrot.slane %v242_v15, 4  ;;  %v4583_v33 = vld [vmem:[%s4540_s9 + $0x18] sm:$0xf] }
  0x20   : > { %v250_v25 = vrot.slane %v248_v17, 5  ;;  %v256_v27 = vshll.u32 %v4565_v16, 16  ;;  %v262_v28 = vshll.u32 %v4568_v18, 16  ;;  %v266_v31 = vshrl.u32 %v4568_v18, 16  ;;  %v4596_v39 = vld [vmem:[%s4540_s9 + $0x1c] sm:$0xf] }
  0x21   : > { %v235_v29 = vor.u32 %v234_v22, %v231_v21  ;;  %v245_v30 = vor.u32 %v244_v24, %v240_v23  ;;  %v272_v32 = vshll.u32 %v4571_v19, 16  ;;  %v255_v35 = vrot.slane %v253_v26, 4  ;;  %v4600_v46 = vld [vmem:[%s4540_s9 + $0x20] sm:$0x1]  ;;  %v4610_v57 = vld [vmem:[%s4540_s9 + $0x24] sm:$0xf] }
  0x22   : > { %v258_v36 = vrot.slane %v256_v27, 5  ;;  %v264_v37 = vrot.slane %v262_v28, 5  ;;  %v4593_v38 = vcombine.low %v4565_v16, %v4568_v18  ;;  %v268_v42 = vrot.slane %v266_v31, 4  ;;  %v4615_v62 = vld [vmem:[%s4540_s9 + $0x28] sm:$0xf]  ;;  %s3196_s7 = sshll.u32 %s161_s6, 7 }
  0x23   : > { %v236_v40 = vrot.slane %v235_v29, 4  ;;  %v246_v41 = vrot.slane %v245_v30, 4  ;;  %v274_v43 = vrot.slane %v272_v32, 5  ;;  %v1199_v45 = vrot.slane %v4571_v19, 5  ;;  %v4623_v4 = vld [vmem:[%s4540_s9 + $0x2c] sm:$0x1] }
  0x24   : > { %v259_v44 = vor.u32 %v258_v36, %v255_v35  ;;  %v277_v47 = vshrl.u32 %v4583_v33, 16  ;;  %v280_v48 = vshll.u32 %v4583_v33, 16  ;;  %v269_v51 = vor.u32 %v268_v42, %v264_v37  ;;  %v4629_v14 = vld [vmem:[%s4540_s9 + $0x30] sm:$0xf]  ;;  %v4641_v28 = vld [vmem:[%s4540_s9 + $0x34] sm:$0xf] }
  0x25   : > { %v241_v49 = vsel %vm4587_vm4, %v236_v40, %v240_v23  ;;  %v251_v50 = vsel %vm4587_vm4, %v246_v41, %v250_v25  ;;  %v286_v52 = vshll.u32 %v4596_v39, 16  ;;  %v290_v60 = vshrl.u32 %v4596_v39, 16  ;;  %v4636_v23 = vld [vmem:[%s5591_s1 + $0x8] sm:$0xf]  ;;  %v4648_v32 = vld [vmem:[%s4540_s9 + $0x38] sm:$0x1] }
  0x26   : > { %v3199_v53 = vcombine.low %v241_v49, %v251_v50  ;;  %v260_v54 = vrot.slane %v259_v44, 4  ;;  %v279_v55 = vrot.slane %v277_v47, 4  ;;  %v282_v56 = vrot.slane %v280_v48, 5  ;;  %v4656_v48 = vld [vmem:[%s4540_s9 + $0x3c] sm:$0xf]  ;;  %s5488_s8 = scalar_lea.vmem [#allocation2], %s3196_s7 }
  0x27   : > { %v270_v58 = vrot.slane %v269_v51, 4  ;;  %v288_v59 = vrot.slane %v286_v52, 5  ;;  %v296_v61 = vshll.u32 %v4600_v46, 16  ;;  %v1203_v1 = vrot.slane %v4596_v39, 5  ;;  %v4664_v52 = vld [vmem:[%s4540_s9 + $0x40] sm:$0xf] }
  0x28   : > { %3743 = vmatprep.mubr.msk.bf16.mxu1 %vm662_vm3, %v3199_v53  ;;  %v265_v63 = vsel %vm4587_vm4, %v260_v54, %v264_v37  ;;  %v283_v0 = vor.u32 %v282_v56, %v279_v55  ;;  %v1206_v2 = vrot.slane %v4600_v46, 5  ;;  %v292_v11 = vrot.slane %v290_v60, 4  ;;  %s3130_s10 = sshll.u32 %s5488_s8, 4  ;;  %s4385_s26 = scalar_lea.vmem %s4384_s25, 4096  ;;  %s5543_s10 = int_to_ptr.vmem [resolvable:$true] %s3130_s10 }
  0x29   : > { %v275_v5 = vsel %vm4587_vm4, %v270_v58, %v274_v43  ;;  %v298_v12 = vrot.slane %v296_v61, 5  ;;  %v301_v13 = vshrl.u32 %v4610_v57, 16  ;;  %v304_v21 = vshll.u32 %v4610_v57, 16  ;;  %s4379_s20 = scalar_lea.vmem %s5543_s10, 2048  ;;  %p4386_p0 = scmp.lt.s32.totalorder %s5543_s10, %s4384_s25 }
  0x2a   : > { %v3200_v15 = vcombine.low %v265_v63, %v275_v5  ;;  %v284_v17 = vrot.slane %v283_v0, 4  ;;  %v310_v22 = vshll.u32 %v4615_v62, 16  ;;  %v293_v24 = vor.u32 %v292_v11, %v288_v59  ;;  %v4676_v5 = vld [vmem:[%s4540_s9 + $0x44] sm:$0x1]  ;;  %p4380_p11 = scmp.ne.s32.totalorder %s5543_s10, %s4379_s20  ;;  %p4387_p1 = scmp.lt.s32.totalorder %s4385_s26, %s4379_s20 }
  0x2b   : > { %v303_v25 = vrot.slane %v301_v13, 4  ;;  %v314_v26 = vshrl.u32 %v4615_v62, 16  ;;  %v320_v27 = vshll.u32 %v4623_v4, 16  ;;  %v306_v30 = vrot.slane %v304_v21, 5  ;;  %v4681_v13 = vld [vmem:[%s4540_s9 + $0x48] sm:$0xf] }
  0x2c   : > { %3879 = vmatprep.mubr.msk.bf16.mxu0 %vm662_vm3, %v3200_v15  ;;  %3744 = vmatmul.mubr.msk.bf16.vlgmr.msra.gmra.mrb[0].mxu1 %vm662_vm3, %v3200_v15  ;;  %v289_v29 = vsel %vm4587_vm4, %v284_v17, %v288_v59  ;;  %v312_v31 = vrot.slane %v310_v22, 5  ;;  %v325_v35 = vshrl.u32 %v4629_v14, 16  ;;  %v294_v36 = vrot.slane %v293_v24, 4  ;;  %v4688_v24 = vld [vmem:[%s4540_s9 + $0x4c] sm:$0xf]  ;;  %p4381_p12 = pnand %p4380_p11, %p4504_p5  ;;  %p4388_p2 = por %p4387_p1, %p4386_p0 }
  0x2d   : > { %3776 = vmatpush3.bf16.msra.mxu1 %v4543_v6  ;;  %v316_v37 = vrot.slane %v314_v26, 4  ;;  %v322_v40 = vrot.slane %v320_v27, 5  ;;  %v328_v41 = vshll.u32 %v4629_v14, 16  ;;  %v307_v42 = vor.u32 %v306_v30, %v303_v25 }
  0x2e   : > { %v327_v43 = vrot.slane %v325_v35, 4  ;;  %v334_v44 = vshll.u32 %v4641_v28, 16  ;;  %v338_v47 = vshrl.u32 %v4641_v28, 16  ;;  %4307 = vmatprep.subr.msk.bf16.mxu1 %vm711_vm0, %v4636_v23  ;;  %v299_v49 = vsel %vm4587_vm4, %v294_v36, %v298_v12  ;;  %p4382_p13 = pneg %p4381_p12 }
  0x2f   : > { %v317_v6 = vor.u32 %v316_v37, %v312_v31  ;;  %v330_v50 = vrot.slane %v328_v41, 5  ;;  %v344_v51 = vshll.u32 %v4648_v32, 16  ;;  %v4666_v53 = vcombine.low %v289_v29, %v299_v49 }
  0x30   : > { %v308_v54 = vrot.slane %v307_v42, 4  ;;  %v336_v55 = vrot.slane %v334_v44, 5  ;;  %v340_v56 = vrot.slane %v338_v47, 4  ;;  %v349_v61 = vshrl.u32 %v4656_v48, 16  ;;  %v4710_v42 = vld [vmem:[%s4540_s9 + $0x54] sm:$0xf]  ;;  %p4389_p3 = pnand %p4388_p2, %p4382_p13 }
  0x31   : > { %5630 = vst [vmem:[#allocation6_spill] sm:$0xff] %v4666_v53  ;;  %v318_v58 = vrot.slane %v317_v6, 4  ;;  %v331_v59 = vor.u32 %v330_v50, %v327_v43  ;;  %v346_v60 = vrot.slane %v344_v51, 5  ;;  %3880 = vmatmul.mubr.msk.bf16.vlgmr.msra.gmra.mrb[0].mxu0 %vm662_vm3, %v4666_v53  ;;  %3747 = vmatprep.mubr.msk.bf16.mxu1 %vm662_vm3, %v4666_v53  ;;  %v352_v11 = vshll.u32 %v4656_v48, 16  ;;  %5632 = vst [vmem:[#allocation8_spill] sm:$0xff] %v4710_v42 }
  0x32   : > { %v313_v63 = vsel %vm4587_vm4, %v308_v54, %v312_v31  ;;  %v341_v0 = vor.u32 %v340_v56, %v336_v55  ;;  %v358_v12 = vshll.u32 %v4664_v52, 16  ;;  %3912 = vmatpush3.bf16.msra.mxu0 %v4546_v7  ;;  %v351_v21 = vrot.slane %v349_v61, 4  ;;  %v4715_v6 = vld [vmem:[%s4540_s9 + $0x58] sm:$0xf] }
  0x33   : > { %v323_v15 = vsel %vm4587_vm4, %v318_v58, %v322_v40  ;;  %v332_v17 = vrot.slane %v331_v59, 4  ;;  %v362_v22 = vshrl.u32 %v4664_v52, 16  ;;  %v354_v27 = vrot.slane %v352_v11, 5  ;;  %4312 = vmatprep.subr.msk.bf16.mxu0 %vm711_vm0, %v4551_v8  ;;  %v4705_v8 = vld [vmem:[%s4540_s9 + $0x50] sm:$0x1] }
  0x34   : > { %v4690_v25 = vcombine.low %v313_v63, %v323_v15  ;;  %v342_v26 = vrot.slane %v341_v0, 4  ;;  %v360_v29 = vrot.slane %v358_v12, 5  ;;  %v368_v31 = vshll.u32 %v4676_v5, 16  ;;  %v4728_v11 = vld [vmem:[%s4540_s9 + $0x5c] sm:$0x1] }
  0x35   : > { %v337_v7 = vsel %vm4587_vm4, %v332_v17, %v336_v55  ;;  %v364_v30 = vrot.slane %v362_v22, 4  ;;  %v373_v35 = vshrl.u32 %v4681_v13, 16  ;;  %v355_v37 = vor.u32 %v354_v27, %v351_v21  ;;  %v4732_v15 = vld [vmem:[%s4540_s9 + $0x60] sm:$0xf]  ;;  %v4737_v27 = vld [vmem:[%s4540_s9 + $0x64] sm:$0xf] }
  0x36   : > { %5631 = vst [vmem:[#allocation7_spill] sm:$0xff] %v4690_v25  ;;  %3883 = vmatprep.mubr.msk.bf16.mxu0 %vm662_vm3, %v4690_v25  ;;  %3748 = vmatmul.mubr.msk.bf16.gmra.mrb[4].mxu1 %vm662_vm3, %v4690_v25  ;;  %v347_v36 = vsel %vm4587_vm4, %v342_v26, %v346_v60  ;;  %v376_v40 = vshll.u32 %v4681_v13, 16  ;;  %v382_v41 = vshll.u32 %v4688_v24, 16  ;;  %v370_v47 = vrot.slane %v368_v31, 5  ;;  %v4949_v25 = vld [vmem:[%s4540_s9 + $0xa8] sm:$0xf] }
  0x37   : > { %v4712_v43 = vcombine.low %v337_v7, %v347_v36  ;;  %v365_v44 = vor.u32 %v364_v30, %v360_v29  ;;  %v375_v49 = vrot.slane %v373_v35, 4  ;;  %v356_v50 = vrot.slane %v355_v37, 4 }
  0x38   : > { %v378_v51 = vrot.slane %v376_v40, 5  ;;  %v384_v54 = vrot.slane %v382_v41, 5  ;;  %v386_v55 = vshrl.u32 %v4688_v24, 16  ;;  %v392_v58 = vshll.u32 %v4705_v8, 16 }
  0x39   : > { %5633 = vst [vmem:[#allocation9_spill] sm:$0xff] %v4712_v43  ;;  %3751 = vmatprep.mubr.msk.bf16.mxu1 %vm662_vm3, %v4712_v43  ;;  %v366_v56 = vrot.slane %v365_v44, 4  ;;  %v397_v59 = vshrl.u32 %v4710_v42, 16  ;;  %v400_v60 = vshll.u32 %v4710_v42, 16  ;;  %3884 = vmatmul.mubr.msk.bf16.gmra.mrb[4].mxu0 %vm662_vm3, %v4712_v43  ;;  %v361_v61 = vsel %vm4587_vm4, %v356_v50, %v360_v29 }
  0x3a   : > { %v379_v63 = vor.u32 %v378_v51, %v375_v49  ;;  %v388_v0 = vrot.slane %v386_v55, 4  ;;  %v406_v12 = vshll.u32 %v4715_v6, 16  ;;  %v394_v21 = vrot.slane %v392_v58, 5 }
  0x3b   : > { %v371_v17 = vsel %vm4587_vm4, %v366_v56, %v370_v47  ;;  %v399_v22 = vrot.slane %v397_v59, 4  ;;  %v402_v26 = vrot.slane %v400_v60, 5  ;;  %v410_v36 = vshrl.u32 %v4715_v6, 16  ;;  %v4751_v47 = vld [vmem:[%s4540_s9 + $0x68] sm:$0x1] }
  0x3c   : > { %v4739_v7 = vcombine.low %v361_v61, %v371_v17  ;;  %v380_v29 = vrot.slane %v379_v63, 4  ;;  %v389_v30 = vor.u32 %v388_v0, %v384_v54  ;;  %v408_v31 = vrot.slane %v406_v12, 5 }
  0x3d   : > { %v403_v35 = vor.u32 %v402_v26, %v399_v22  ;;  %v416_v37 = vshll.u32 %v4728_v11, 16  ;;  %v421_v40 = vshrl.u32 %v4732_v15, 16  ;;  %v424_v49 = vshll.u32 %v4732_v15, 16 }
  0x3e   : > { %5634 = vst [vmem:[#allocation10_spill] sm:$0xff] %v4739_v7  ;;  %3887 = vmatprep.mubr.msk.bf16.mxu0 %vm662_vm3, %v4739_v7  ;;  %3752 = vmatmul.mubr.msk.bf16.gmra.mrb[8].mxu1 %vm662_vm3, %v4739_v7  ;;  %v385_v41 = vsel %vm4587_vm4, %v380_v29, %v384_v54  ;;  %v390_v44 = vrot.slane %v389_v30, 4  ;;  %v430_v50 = vshll.u32 %v4737_v27, 16  ;;  %v412_v55 = vrot.slane %v410_v36, 4  ;;  %v4759_v54 = vld [vmem:[%s4540_s9 + $0x6c] sm:$0xf] }
  0x3f   : > { %v404_v51 = vrot.slane %v403_v35, 4  ;;  %v418_v56 = vrot.slane %v416_v37, 5  ;;  %v423_v58 = vrot.slane %v421_v40, 4  ;;  %v426_v60 = vrot.slane %v424_v49, 5  ;;  %v4775_v36 = vld [vmem:[%s4540_s9 + $0x70] sm:$0xf] }
  0x40   : > { %v395_v59 = vsel %vm4587_vm4, %v390_v44, %v394_v21  ;;  %v432_v61 = vrot.slane %v430_v50, 5  ;;  %v434_v63 = vshrl.u32 %v4737_v27, 16  ;;  %v413_v17 = vor.u32 %v412_v55, %v408_v31  ;;  %v4926_v7 = vld [vmem:[%s4540_s9 + $0xa0] sm:$0xf] }
  0x41   : > { %v4761_v0 = vcombine.low %v385_v41, %v395_v59  ;;  %v409_v12 = vsel %vm4587_vm4, %v404_v51, %v408_v31  ;;  %v440_v22 = vshll.u32 %v4751_v47, 16  ;;  %v427_v21 = vor.u32 %v426_v60, %v423_v58  ;;  %v4788_v51 = vld [vmem:[%s4540_s9 + $0x74] sm:$0x1] }
  0x42   : > { %v436_v29 = vrot.slane %v434_v63, 4  ;;  %v3264_v30 = vrot.slane %v4565_v16, 9  ;;  %v1196_v35 = vrot.slane %v4568_v18, 5  ;;  %v414_v31 = vrot.slane %v413_v17, 4 }
  0x43   : > { %5635 = vst [vmem:[#allocation11_spill] sm:$0xff] %v4761_v0  ;;  %3888 = vmatmul.mubr.msk.bf16.gmra.mrb[8].mxu0 %vm662_vm3, %v4761_v0  ;;  %3755 = vmatprep.mubr.msk.bf16.mxu1 %vm662_vm3, %v4761_v0  ;;  %v442_v37 = vrot.slane %v440_v22, 5  ;;  %v445_v40 = vshrl.u32 %v4759_v54, 16  ;;  %v448_v41 = vshll.u32 %v4759_v54, 16  ;;  %v428_v44 = vrot.slane %v427_v21, 4 }
  0x44   : > { %v437_v49 = vor.u32 %v436_v29, %v432_v61  ;;  %v1197_v16 = vsel %vm4768_vm7, %v3264_v30, %v1196_v35  ;;  %v1198_v18 = vrot.slane %v1196_v35, 4  ;;  %v419_v50 = vsel %vm4587_vm4, %v414_v31, %v418_v56  ;;  %v4800_v56 = vld [vmem:[%s4540_s9 + $0x78] sm:$0xf]  ;;  %v4816_v31 = vld [vmem:[%s4540_s9 + $0x7c] sm:$0xf] }
  0x45   : > { %v447_v55 = vrot.slane %v445_v40, 4  ;;  %v450_v58 = vrot.slane %v448_v41, 5  ;;  %v454_v59 = vshll.u32 %v4775_v36, 16  ;;  %v4791_v60 = vcombine.low %v409_v12, %v419_v50 }
  0x46   : > { %v433_v63 = vsel %vm4587_vm4, %v428_v44, %v432_v61  ;;  %v438_v17 = vrot.slane %v437_v49, 4  ;;  %v1200_v22 = vsel %vm4768_vm7, %v1198_v18, %v1199_v45  ;;  %v458_v35 = vshrl.u32 %v4775_v36, 16  ;;  %v4821_v49 = vld [vmem:[%s4540_s9 + $0x80] sm:$0x1] }
  0x47   : > { %5638 = vst [vmem:[#allocation12_spill] sm:$0xff] %v4791_v60  ;;  %v4802_v21 = vcombine.low %v1197_v16, %v1200_v22  ;;  %v451_v29 = vor.u32 %v450_v58, %v447_v55  ;;  %v456_v30 = vrot.slane %v454_v59, 5  ;;  %3891 = vmatprep.mubr.msk.bf16.mxu0 %vm662_vm3, %v4791_v60  ;;  %3756 = vmatmul.mubr.msk.bf16.gmra.mrb[12].mxu1 %vm662_vm3, %v4791_v60  ;;  %v464_v45 = vshll.u32 %v4788_v51, 16  ;;  %v4919_v60 = vld [vmem:[%s4540_s9 + $0x9c] sm:$0xf] }
  0x48   : > { %v443_v19 = vsel %vm4587_vm4, %v438_v17, %v442_v37  ;;  %v3265_v61 = vrot.slane %v4583_v33, 9  ;;  %v1205_v12 = vrot.slane %v1203_v1, 4  ;;  %v460_v44 = vrot.slane %v458_v35, 4 }
  0x49   : > { %5639 = vst [vmem:[#allocation13_spill] sm:$0xff] %v4802_v21  ;;  %v4818_v40 = vcombine.low %v433_v63, %v443_v19  ;;  %v452_v41 = vrot.slane %v451_v29, 4  ;;  %v469_v16 = vshrl.u32 %v4800_v56, 16  ;;  %v466_v18 = vrot.slane %v464_v45, 5  ;;  %v4847_v29 = vld [vmem:[%s4540_s9 + $0x84] sm:$0xf] }
  0x4a   : > { %v1204_v37 = vsel %vm4768_vm7, %v3265_v61, %v1203_v1  ;;  %v1207_v50 = vsel %vm4768_vm7, %v1205_v12, %v1206_v2  ;;  %v472_v55 = vshll.u32 %v4800_v56, 16  ;;  %v461_v59 = vor.u32 %v460_v44, %v456_v30 }
  0x4b   : > { %5640 = vst [vmem:[#allocation14_spill] sm:$0xff] %v4818_v40  ;;  %3892 = vmatmul.mubr.msk.bf16.gmra.mrb[12].mxu0 %vm662_vm3, %v4818_v40  ;;  %3759 = vmatprep.mubr.msk.bf16.mxu1 %vm662_vm3, %v4818_v40  ;;  %v457_v58 = vsel %vm4587_vm4, %v452_v41, %v456_v30  ;;  %v4839_v63 = vcombine.low %v1204_v37, %v1207_v50  ;;  %v471_v1 = vrot.slane %v469_v16, 4  ;;  %v478_v2 = vshll.u32 %v4816_v31, 16  ;;  %v4853_v16 = vld [vmem:[%s4540_s9 + $0x88] sm:$0xf] }
  0x4c   : > { %3913 = vmatprep.mubr.msk.bf16.mxu0 %vm662_vm3, %v4802_v21  ;;  %v474_v46 = vrot.slane %v472_v55, 5  ;;  %v482_v17 = vshrl.u32 %v4816_v31, 16  ;;  %v488_v22 = vshll.u32 %v4821_v49, 16  ;;  %v462_v35 = vrot.slane %v461_v59, 4 }
  0x4d   : > { %5641 = vst [vmem:[#allocation15_spill] sm:$0xff] %v4839_v63  ;;  %v3266_v30 = vrot.slane %v4610_v57, 9  ;;  %v1210_v19 = vrot.slane %v4615_v62, 5  ;;  %v1213_v45 = vrot.slane %v4623_v4, 5  ;;  %v480_v12 = vrot.slane %v478_v2, 5 }
  0x4e   : > { %v475_v61 = vor.u32 %v474_v46, %v471_v1  ;;  %v484_v41 = vrot.slane %v482_v17, 4  ;;  %v490_v44 = vrot.slane %v488_v22, 5  ;;  %v467_v37 = vsel %vm4587_vm4, %v462_v35, %v466_v18  ;;  %v4863_v1 = vld [vmem:[%s4540_s9 + $0x8c] sm:$0x1] }
  0x4f   : > { %v1211_v50 = vsel %vm4768_vm7, %v3266_v30, %v1210_v19  ;;  %v1212_v55 = vrot.slane %v1210_v19, 4  ;;  %v493_v59 = vshrl.u32 %v4847_v29, 16  ;;  %v4860_v3 = vcombine.low %v457_v58, %v467_v37 }
  0x50   : > { %v476_v40 = vrot.slane %v475_v61, 4  ;;  %v485_v4 = vor.u32 %v484_v41, %v480_v12  ;;  %v496_v46 = vshll.u32 %v4847_v29, 16  ;;  %v502_v18 = vshll.u32 %v4853_v16, 16  ;;  %v4877_v61 = vld [vmem:[%s4540_s9 + $0x90] sm:$0xf] }
  0x51   : > { %5642 = vst [vmem:[#allocation16_spill] sm:$0xff] %v4860_v3  ;;  %v1214_v2 = vsel %vm4768_vm7, %v1212_v55, %v1213_v45  ;;  %v495_v17 = vrot.slane %v493_v59, 4  ;;  %v506_v22 = vshrl.u32 %v4853_v16, 16  ;;  %3760 = vmatmul.mubr.msk.bf16.gmra.mrb[16].mxu1 %vm662_vm3, %v4860_v3  ;;  %v4882_v45 = vld [vmem:[%s5591_s1 + $0x1c] sm:$0xf]  ;;  %v1217_v59 = vrot.slane %v4641_v28, 5 }
  0x52   : > { %v481_v58 = vsel %vm4587_vm4, %v476_v40, %v480_v12  ;;  %v486_v35 = vrot.slane %v485_v4, 4  ;;  %v4874_v30 = vcombine.low %v1211_v50, %v1214_v2  ;;  %v498_v19 = vrot.slane %v496_v46, 5  ;;  %5644 = vst [vmem:[#allocation18_spill] sm:$0xff] %v4882_v45  ;;  %v4896_v46 = vld [vmem:[%s4540_s9 + $0x94] sm:$0xf] }
  0x53   : > { %3914 = vmatmul.mubr.msk.bf16.vlgmr.msra.gmra.mrb[0].mxu0 %vm662_vm3, %v4839_v63  ;;  %v504_v41 = vrot.slane %v502_v18, 5  ;;  %v508_v37 = vrot.slane %v506_v22, 4  ;;  %v512_v40 = vshll.u32 %v4863_v1, 16  ;;  %v3267_v12 = vrot.slane %v4629_v14, 9  ;;  %v4901_v3 = vld [vmem:[%s4540_s9 + $0x98] sm:$0x1] }
  0x54   : > { %5643 = vst [vmem:[#allocation17_spill] sm:$0xff] %v4874_v30  ;;  %3946 = vmatpush3.bf16.msra.mxu0 %v4575_v20  ;;  %v491_v50 = vsel %vm4587_vm4, %v486_v35, %v490_v44  ;;  %3917 = vmatprep.mubr.msk.bf16.mxu0 %vm662_vm3, %v4874_v30  ;;  %v499_v55 = vor.u32 %v498_v19, %v495_v17  ;;  %v1220_v4 = vrot.slane %v4648_v32, 5  ;;  %v517_v20 = vshrl.u32 %v4877_v61, 16 }
  0x55   : > { %v4898_v2 = vcombine.low %v481_v58, %v491_v50  ;;  %v509_v18 = vor.u32 %v508_v37, %v504_v41  ;;  %v514_v22 = vrot.slane %v512_v40, 5  ;;  %4313 = vmatprep.subr.msk.bf16.mxu0 %vm711_vm0, %v4882_v45  ;;  %v1218_v17 = vsel %vm4768_vm7, %v3267_v12, %v1217_v59 }
  0x56   : > { %v500_v44 = vrot.slane %v499_v55, 4  ;;  %v1219_v35 = vrot.slane %v1217_v59, 4  ;;  %v520_v32 = vshll.u32 %v4877_v61, 16  ;;  %v519_v19 = vrot.slane %v517_v20, 4 }
  0x57   : > { %5645 = vst [vmem:[#allocation19_spill] sm:$0xff] %v4898_v2  ;;  %3763 = vmatprep.mubr.msk.bf16.mxu1 %vm662_vm3, %v4898_v2  ;;  %v510_v58 = vrot.slane %v509_v18, 4  ;;  %v526_v37 = vshll.u32 %v4896_v46, 16  ;;  %v530_v40 = vshrl.u32 %v4896_v46, 16  ;;  %v536_v59 = vshll.u32 %v4901_v3, 16 }
  0x58   : > { %v505_v50 = vsel %vm4587_vm4, %v500_v44, %v504_v41  ;;  %v1221_v55 = vsel %vm4768_vm7, %v1219_v35, %v1220_v4  ;;  %v522_v12 = vrot.slane %v520_v32, 5  ;;  %v3268_v4 = vrot.slane %v4656_v48, 9 }
  0x59   : > { %v515_v2 = vsel %vm4587_vm4, %v510_v58, %v514_v22  ;;  %v4923_v18 = vcombine.low %v1218_v17, %v1221_v55  ;;  %v528_v20 = vrot.slane %v526_v37, 5  ;;  %v532_v0 = vrot.slane %v530_v40, 4  ;;  %v4939_v58 = vld [vmem:[%s4540_s9 + $0xa4] sm:$0x1] }
  0x5a   : > { %v4928_v43 = vcombine.low %v505_v50, %v515_v2  ;;  %v523_v41 = vor.u32 %v522_v12, %v519_v19  ;;  %v538_v44 = vrot.slane %v536_v59, 5  ;;  %v1224_v32 = vrot.slane %v4664_v52, 5 }
  0x5b   : > { %5646 = vst [vmem:[#allocation20_spill] sm:$0xff] %v4923_v18  ;;  %3918 = vmatmul.mubr.msk.bf16.gmra.mrb[4].mxu0 %vm662_vm3, %v4923_v18  ;;  %v533_v35 = vor.u32 %v532_v0, %v528_v20  ;;  %v1227_v22 = vrot.slane %v4676_v5, 5  ;;  %v541_v17 = vshrl.u32 %v4919_v60, 16  ;;  %v544_v19 = vshll.u32 %v4919_v60, 16 }
  0x5c   : > { %5647 = vst [vmem:[#allocation21_spill] sm:$0xff] %v4928_v43  ;;  %3764 = vmatmul.mubr.msk.bf16.gmra.mrb[20].mxu1 %vm662_vm3, %v4928_v43  ;;  %v524_v2 = vrot.slane %v523_v41, 4  ;;  %v550_v37 = vshll.u32 %v4926_v7, 16  ;;  %v554_v0 = vshrl.u32 %v4926_v7, 16  ;;  %v1225_v5 = vsel %vm4768_vm7, %v3268_v4, %v1224_v32 }
  0x5d   : > { %v534_v40 = vrot.slane %v533_v35, 4  ;;  %v1226_v50 = vrot.slane %v1224_v32, 4  ;;  %v543_v55 = vrot.slane %v541_v17, 4  ;;  %v546_v59 = vrot.slane %v544_v19, 5  ;;  %v4958_v32 = vld [vmem:[%s4540_s9 + $0xac] sm:$0xf] }
  0x5e   : > { %v529_v12 = vsel %vm4587_vm4, %v524_v2, %v528_v20  ;;  %v552_v41 = vrot.slane %v550_v37, 5  ;;  %v556_v43 = vrot.slane %v554_v0, 4  ;;  %v560_v35 = vshll.u32 %v4939_v58, 16 }
  0x5f   : > { %v539_v53 = vsel %vm4587_vm4, %v534_v40, %v538_v44  ;;  %v1228_v18 = vsel %vm4768_vm7, %v1226_v50, %v1227_v22  ;;  %v3269_v4 = vrot.slane %v4681_v13, 9  ;;  %v547_v2 = vor.u32 %v546_v59, %v543_v55 }
  0x60   : > { %v4960_v17 = vcombine.low %v529_v12, %v539_v53  ;;  %v4962_v20 = vcombine.low %v1225_v5, %v1228_v18  ;;  %v557_v19 = vor.u32 %v556_v43, %v552_v41  ;;  %v562_v37 = vrot.slane %v560_v35, 5  ;;  %v4972_v18 = vld [vmem:[%s4540_s9 + $0xb0] sm:$0x1] }
  0x61   : > { %v1231_v0 = vrot.slane %v4688_v24, 5  ;;  %v1234_v44 = vrot.slane %v4705_v8, 5  ;;  %v565_v22 = vshrl.u32 %v4949_v25, 16  ;;  %v548_v53 = vrot.slane %v547_v2, 4 }
  0x62   : > { %5648 = vst [vmem:[#allocation22_spill] sm:$0xff] %v4960_v17  ;;  %5649 = vst [vmem:[#allocation23_spill] sm:$0xff] %v4962_v20  ;;  %3767 = vmatprep.mubr.msk.bf16.mxu1 %vm662_vm3, %v4960_v17  ;;  %3921 = vmatprep.mubr.msk.bf16.mxu0 %vm662_vm3, %v4962_v20  ;;  %v558_v40 = vrot.slane %v557_v19, 4  ;;  %v568_v43 = vshll.u32 %v4949_v25, 16  ;;  %v574_v5 = vshll.u32 %v4958_v32, 16  ;;  %v578_v12 = vshrl.u32 %v4958_v32, 16 }
  0x63   : > { %v1232_v8 = vsel %vm4768_vm7, %v3269_v4, %v1231_v0  ;;  %v1233_v50 = vrot.slane %v1231_v0, 4  ;;  %v567_v55 = vrot.slane %v565_v22, 4  ;;  %v553_v59 = vsel %vm4587_vm4, %v548_v53, %v552_v41  ;;  %v4984_v17 = vld [vmem:[%s4540_s9 + $0xb4] sm:$0xf]  ;;  %v4996_v53 = vld [vmem:[%s4540_s9 + $0xb8] sm:$0xf] }
  0x64   : > { %v563_v35 = vsel %vm4587_vm4, %v558_v40, %v562_v37  ;;  %v570_v2 = vrot.slane %v568_v43, 5  ;;  %v576_v19 = vrot.slane %v574_v5, 5  ;;  %v580_v0 = vrot.slane %v578_v12, 4 }
  0x65   : > { %v4986_v20 = vcombine.low %v553_v59, %v563_v35  ;;  %v1235_v4 = vsel %vm4768_vm7, %v1233_v50, %v1234_v44  ;;  %v584_v22 = vshll.u32 %v4972_v18, 16  ;;  %v3270_v41 = vrot.slane %v4710_v42, 9  ;;  %v5002_v44 = vld [vmem:[%s4540_s9 + $0xbc] sm:$0x1] }
  0x66   : > { %v4991_v30 = vcombine.low %v1232_v8, %v1235_v4  ;;  %v571_v63 = vor.u32 %v570_v2, %v567_v55  ;;  %v1238_v37 = vrot.slane %v4715_v6, 5  ;;  %v581_v40 = vor.u32 %v580_v0, %v576_v19 }
  0x67   : > { %5650 = vst [vmem:[#allocation24_spill] sm:$0xff] %v4986_v20  ;;  %3768 = vmatmul.mubr.msk.bf16.gmra.mrb[24].mxu1 %vm662_vm3, %v4986_v20  ;;  %v586_v43 = vrot.slane %v584_v22, 5  ;;  %v1241_v5 = vrot.slane %v4728_v11, 5  ;;  %v589_v50 = vshrl.u32 %v4984_v17, 16  ;;  %v592_v59 = vshll.u32 %v4984_v17, 16 }
  0x68   : > { %5651 = vst [vmem:[#allocation25_spill] sm:$0xff] %v4991_v30  ;;  %3922 = vmatmul.mubr.msk.bf16.gmra.mrb[8].mxu0 %vm662_vm3, %v4991_v30  ;;  %v572_v8 = vrot.slane %v571_v63, 4  ;;  %v1239_v55 = vsel %vm4768_vm7, %v3270_v41, %v1238_v37  ;;  %v1240_v12 = vrot.slane %v1238_v37, 4  ;;  %v582_v35 = vrot.slane %v581_v40, 4 }
  0x69   : > { %v591_v2 = vrot.slane %v589_v50, 4  ;;  %v598_v4 = vshll.u32 %v4996_v53, 16  ;;  %v602_v11 = vshrl.u32 %v4996_v53, 16  ;;  %v594_v20 = vrot.slane %v592_v59, 5 }
  0x6a   : > { %v577_v0 = vsel %vm4587_vm4, %v572_v8, %v576_v19  ;;  %v1242_v22 = vsel %vm4768_vm7, %v1240_v12, %v1241_v5  ;;  %v608_v63 = vshll.u32 %v5002_v44, 16  ;;  %v587_v41 = vsel %vm4587_vm4, %v582_v35, %v586_v43 }
  0x6b   : > { %v5019_v37 = vcombine.low %v1239_v55, %v1242_v22  ;;  %v600_v40 = vrot.slane %v598_v4, 5  ;;  %v604_v50 = vrot.slane %v602_v11, 4  ;;  %v5021_v30 = vcombine.low %v577_v0, %v587_v41 }
  0x6c   : > { %v595_v21 = vor.u32 %v594_v20, %v591_v2  ;;  %v610_v45 = vrot.slane %v608_v63, 5  ;;  %v3271_v42 = vrot.slane %v4732_v15, 9  ;;  %v1245_v5 = vrot.slane %v4737_v27, 5 }
  0x6d   : > { %3925 = vmatprep.mubr.msk.bf16.mxu0 %vm662_vm3, %v5019_v37  ;;  %v605_v19 = vor.u32 %v604_v50, %v600_v40  ;;  %v1248_v8 = vrot.slane %v4751_v47, 5  ;;  %v3272_v43 = vrot.slane %v4759_v54, 9  ;;  %3771 = vmatprep.mubr.msk.bf16.mxu1 %vm662_vm3, %v5021_v30  ;;  %v3231_v20 = vcombine.low %v4554_v9, %v4557_v10 }
  0x6e   : > { %v596_v55 = vrot.slane %v595_v21, 4  ;;  %v1252_v12 = vrot.slane %v4775_v36, 5  ;;  %v1255_v59 = vrot.slane %v4788_v51, 5  ;;  %v1246_v2 = vsel %vm4768_vm7, %v3271_v42, %v1245_v5 }
  0x6f   : > { %v606_v35 = vrot.slane %v605_v19, 4  ;;  %v1247_v4 = vrot.slane %v1245_v5, 4  ;;  %v1259_v47 = vrot.slane %v4816_v31, 5  ;;  %v3273_v9 = vrot.slane %v4800_v56, 9 }
  0x70   : > { %v601_v11 = vsel %vm4587_vm4, %v596_v55, %v600_v40  ;;  %v1253_v21 = vsel %vm4768_vm7, %v3272_v43, %v1252_v12  ;;  %v1254_v0 = vrot.slane %v1252_v12, 4  ;;  %v1262_v42 = vrot.slane %v4821_v49, 5 }
  0x71   : > { %v611_v10 = vsel %vm4587_vm4, %v606_v35, %v610_v45  ;;  %v1249_v51 = vsel %vm4768_vm7, %v1247_v4, %v1248_v8  ;;  %v1261_v22 = vrot.slane %v1259_v47, 4  ;;  %v3274_v19 = vrot.slane %v4847_v29, 9 }
  0x72   : > { %v5048_v63 = vcombine.low %v601_v11, %v611_v10  ;;  %v5050_v41 = vcombine.low %v1246_v2, %v1249_v51  ;;  %v1256_v40 = vsel %vm4768_vm7, %v1254_v0, %v1255_v59  ;;  %v1266_v5 = vrot.slane %v4853_v16, 5 }
  0x73   : > { %v5054_v50 = vcombine.low %v1253_v21, %v1256_v40  ;;  %v1269_v49 = vrot.slane %v4863_v1, 5  ;;  %v1260_v45 = vsel %vm4768_vm7, %v3273_v9, %v1259_v47  ;;  %v1263_v8 = vsel %vm4768_vm7, %v1261_v22, %v1262_v42 }
  0x74   : > { %3772 = vmatmul.mubr.msk.bf16.gmra.mrb[28].mxu1 %vm662_vm3, %v5048_v63  ;;  %3926 = vmatmul.mubr.msk.bf16.gmra.mrb[12].mxu0 %vm662_vm3, %v5050_v41  ;;  %v1268_v43 = vrot.slane %v1266_v5, 4  ;;  %v1273_v55 = vrot.slane %v4896_v46, 5  ;;  %v1280_v12 = vrot.slane %v4926_v7, 5  ;;  %v1267_v59 = vsel %vm4768_vm7, %v3274_v19, %v1266_v5 }
  0x75   : > { %3777 = vmatprep.mubr.msk.bf16.mxu1 %vm662_vm3, %v3231_v20  ;;  %3929 = vmatprep.mubr.msk.bf16.mxu0 %vm662_vm3, %v5054_v50  ;;  %v5076_v20 = vcombine.low %v1260_v45, %v1263_v8  ;;  %v3275_v35 = vrot.slane %v4877_v61, 9  ;;  %v1276_v4 = vrot.slane %v4901_v3, 5  ;;  %v5082_v47 = vcombine.low %v4583_v33, %v4596_v39  ;;  %v5094_v3 = vld [vmem:[%s5591_s1 + $0xc] sm:$0xf] }
  0x76   : > { %v1270_v1 = vsel %vm4768_vm7, %v1268_v43, %v1269_v49  ;;  %v1275_v2 = vrot.slane %v1273_v55, 4  ;;  %v3276_v11 = vrot.slane %v4919_v60, 9  ;;  %v1398_v21 = vsel %vm711_vm0, %v4636_v23, 0 }
  0x77   : > { %v5087_v0 = vcombine.low %v1267_v59, %v1270_v1  ;;  %v1282_v9 = vrot.slane %v1280_v12, 4  ;;  %v1283_v10 = vrot.slane %v4939_v58, 5  ;;  %v1287_v51 = vrot.slane %v4958_v32, 5 }
  0x78   : > { %v1274_v33 = vsel %vm4768_vm7, %v3275_v35, %v1273_v55  ;;  %v1277_v39 = vsel %vm4768_vm7, %v1275_v2, %v1276_v4  ;;  %v5108_v23 = vcombine.low %v4610_v57, %v4615_v62  ;;  %v1281_v58 = vsel %vm4768_vm7, %v3276_v11, %v1280_v12 }
  0x79   : > { %v5114_v22 = vcombine.low %v4732_v15, %v4737_v27  ;;  %v1284_v42 = vsel %vm4768_vm7, %v1282_v9, %v1283_v10  ;;  %v3277_v40 = vrot.slane %v4949_v25, 9  ;;  %v1294_v19 = vrot.slane %v4996_v53, 5 }
  0x7a   : > { %v5124_v57 = vcombine.low %v4759_v54, %v4775_v36  ;;  %v5128_v62 = vcombine.low %v1274_v33, %v1277_v39  ;;  %v1289_v15 = vrot.slane %v1287_v51, 4  ;;  %v1290_v27 = vrot.slane %v4972_v18, 5  ;;  %v220_v18 = vld [vmem:[%s4540_s9 + $0xc8] sm:$0x1] }
  0x7b   : > { %v5133_v5 = vcombine.low %v4800_v56, %v4816_v31  ;;  %v5137_v49 = vcombine.low %v4847_v29, %v4853_v16  ;;  %v5141_v54 = vcombine.low %v4877_v61, %v4896_v46  ;;  %v5145_v36 = vcombine.low %v4919_v60, %v4926_v7  ;;  %v5164_v61 = vld [vmem:[%s4540_s9 + $0xc4] sm:$0xf] }
  0x7c   : > { %3778 = vmatmul.mubr.msk.bf16.vlgmr.msra.gmra.mrb[0].mxu1 %vm662_vm3, %v4593_v38  ;;  %3930 = vmatmul.mubr.msk.bf16.gmra.mrb[16].mxu0 %vm662_vm3, %v5076_v20  ;;  %v5149_v45 = vcombine.low %v4949_v25, %v4958_v32  ;;  %v5153_v56 = vcombine.low %v4629_v14, %v4641_v28  ;;  %v5155_v31 = vcombine.low %v1281_v58, %v1284_v42  ;;  %v3278_v16 = vrot.slane %v4984_v17, 9  ;;  %v5652_v42 = vld [vmem:[#allocation8_spill] sm:$0xff] }
  0x7d   : > { %3810 = vmatpush3.bf16.msra.mxu1 %v1398_v21  ;;  %3781 = vmatprep.mubr.msk.bf16.mxu1 %vm662_vm3, %v5082_v47  ;;  %v5159_v29 = vcombine.low %v4984_v17, %v4996_v53  ;;  %v1296_v7 = vrot.slane %v1294_v19, 4  ;;  %v1297_v60 = vrot.slane %v5002_v44, 5  ;;  %v1288_v14 = vsel %vm4768_vm7, %v3277_v40, %v1287_v51  ;;  %v5184_v17 = vld [vmem:[%s4540_s9 + $0xc0] sm:$0xf] }
  0x7e   : > { %3933 = vmatprep.mubr.msk.bf16.mxu0 %vm662_vm3, %v5087_v0  ;;  %4308 = vmatprep.subr.msk.bf16.mxu1 %vm711_vm0, %v5094_v3  ;;  %v1291_v28 = vsel %vm4768_vm7, %v1289_v15, %v1290_v27  ;;  %v2030_v25 = vrot.slane %v5164_v61, 5  ;;  %v1295_v46 = vsel %vm4768_vm7, %v3278_v16, %v1294_v19  ;;  %v5189_v53 = vcombine.low %v4656_v48, %v4664_v52 }
  0x7f   : > { %v1298_v32 = vsel %vm4768_vm7, %v1296_v7, %v1297_v60  ;;  %v5191_v44 = vcombine.low %v1288_v14, %v1291_v28  ;;  %v5195_v8 = vcombine.low %v4681_v13, %v4688_v24  ;;  %v1800_v43 = vshrl.u32 %v5184_v17, 16  ;;  %v3404_v60 = vld [vmem:[%s5591_s1 + $0x20] sm:$0xf]  ;;  %v4375_v14 = vld [vmem:[%s4540_s9 + $0x4] sm:$0xf] }
  0x80   : > { %v1803_v55 = vshll.u32 %v5184_v17, 16  ;;  %v1809_v12 = vshll.u32 %v5164_v61, 16  ;;  %v1813_v59 = vshrl.u32 %v5164_v61, 16  ;;  %v5201_v1 = vcombine.low %v1295_v46, %v1298_v32  ;;  %v4377_v32 = vld [vmem:[%s4540_s9] sm:$0xf] }
  0x81   : > { %v3348_v35 = vrot.slane %v5184_v17, 9  ;;  %v2032_v48 = vrot.slane %v2030_v25, 4  ;;  %v2033_v52 = vrot.slane %v220_v18, 5  ;;  %v1802_v2 = vrot.slane %v1800_v43, 4 }
  0x82   : > { %v1805_v4 = vrot.slane %v1803_v55, 5  ;;  %v1811_v11 = vrot.slane %v1809_v12, 5  ;;  %v1815_v21 = vrot.slane %v1813_v59, 4  ;;  %v1819_v9 = vshll.u32 %v220_v18, 16 }
  0x83   : > { %v2031_v10 = vsel %vm4768_vm7, %v3348_v35, %v2030_v25  ;;  %v2034_v51 = vsel %vm4768_vm7, %v2032_v48, %v2033_v52  ;;  %v5218_v40 = vcombine.low %v5652_v42, %v4715_v6  ;;  %v5653_v6 = vld [vmem:[#allocation18_spill] sm:$0xff]  ;;  %v1189_v28 = vrot.slane %v4375_v14, 5  ;;  %v4376_v25 = vld [vmem:[%s4540_s9 + $0x8] sm:$0x1]  ;;  %v5654_v48 = vld [vmem:[#allocation13_spill] sm:$0xff] }
  0x84   : > { %3782 = vmatmul.mubr.msk.bf16.gmra.mrb[4].mxu1 %vm662_vm3, %v5108_v23  ;;  %3934 = vmatmul.mubr.msk.bf16.gmra.mrb[20].mxu0 %vm662_vm3, %v5128_v62  ;;  %v1806_v13 = vor.u32 %v1805_v4, %v1802_v2  ;;  %v1816_v24 = vor.u32 %v1815_v21, %v1811_v11  ;;  %v1821_v58 = vrot.slane %v1819_v9, 5  ;;  %v5220_v19 = vcombine.low %v2031_v10, %v2034_v51  ;;  %v5655_v52 = vld [vmem:[#allocation15_spill] sm:$0xff]  ;;  %v4378_v2 = vld [vmem:[%s5591_s1 + $0x10] sm:$0xf]  ;;  %v5657_v4 = vld [vmem:[#allocation20_spill] sm:$0xff] }
  0x85   : > { %3785 = vmatprep.mubr.msk.bf16.mxu1 %vm662_vm3, %v5153_v56  ;;  %3937 = vmatprep.mubr.msk.bf16.mxu0 %vm662_vm3, %v5155_v31  ;;  %v2478_v7 = vsel %vm711_vm0, %v5653_v6, 0  ;;  %v1192_v46 = vrot.slane %v4376_v25, 5  ;;  %v3263_v18 = vrot.slane %v4377_v32, 9  ;;  %v1191_v43 = vrot.slane %v1189_v28, 4  ;;  %v5658_v21 = vld [vmem:[#allocation23_spill] sm:$0xff]  ;;  %v5665_v42 = vld [vmem:[#allocation12_spill] sm:$0xff] }
  0x86   : > { %v1807_v33 = vrot.slane %v1806_v13, 4  ;;  %v1817_v39 = vrot.slane %v1816_v24, 4  ;;  %v1604_v35 = vsel %vm711_vm0, %v5094_v3, 0  ;;  %v5656_v3 = vld [vmem:[#allocation17_spill] sm:$0xff]  ;;  %v5315_v24 = vld [vmem:[%s4540_s9 + $0xcc] sm:$0xf] }
  0x87   : > { %v1190_v55 = vsel %vm4768_vm7, %v3263_v18, %v1189_v28  ;;  %v1193_v12 = vsel %vm4768_vm7, %v1191_v43, %v1192_v46  ;;  %v5659_v13 = vld [vmem:[#allocation25_spill] sm:$0xff]  ;;  %v2690_v10 = vsel %vm711_vm0, %v3404_v60, 0  ;;  %v5661_v51 = vld [vmem:[#allocation7_spill] sm:$0xff]  ;;  %v2449_v14 = vshll.u32 %v5315_v24, 16  ;;  %v5671_v46 = vld [vmem:[#allocation22_spill] sm:$0xff] }
  0x88   : > { %v1812_v15 = vsel %vm4587_vm4, %v1807_v33, %v1811_v11  ;;  %v1822_v27 = vsel %vm4587_vm4, %v1817_v39, %v1821_v58  ;;  %v3280_v59 = vcombine.low %v1190_v55, %v1193_v12  ;;  %v5304_v11 = vcombine.low %v5184_v17, %v5164_v61  ;;  %v5318_v9 = vld [vmem:[%s4540_s9 + $0xd0] sm:$0xf]  ;;  %v5660_v17 = vld [vmem:[#allocation6_spill] sm:$0xff]  ;;  %v5664_v58 = vld [vmem:[#allocation11_spill] sm:$0xff] }
  0x89   : > { %v5226_v16 = vcombine.low %v1812_v15, %v1822_v27  ;;  %v3368_v61 = vcombine.low %v5315_v24, %v5318_v9  ;;  %v5662_v33 = vld [vmem:[#allocation9_spill] sm:$0xff]  ;;  %v5663_v39 = vld [vmem:[#allocation10_spill] sm:$0xff]  ;;  %v5667_v27 = vld [vmem:[#allocation16_spill] sm:$0xff]  ;;  %v2459_v28 = vshrl.u32 %v5318_v9, 16  ;;  %v2451_v32 = vrot.slane %v2449_v14, 5 }
  0x8a   : > { %v5666_v15 = vld [vmem:[#allocation14_spill] sm:$0xff]  ;;  %v5668_v6 = vld [vmem:[#allocation19_spill] sm:$0xff]  ;;  %v5670_v25 = vld [vmem:[#allocation5_spill] sm:$0xff]  ;;  %v2676_v34 = vrot.slane %v5318_v9, 5 }
  0x8b   : > { %v2461_v43 = vrot.slane %v2459_v28, 4  ;;  %v223_v55 = vld [vmem:[%s4540_s9 + $0xd4] sm:$0x1]  ;;  %v5672_v12 = vld [vmem:[#allocation24_spill] sm:$0xff]  ;;  %s3492_s9 = sshll.u32 %s4487_s16, 11  ;;  %s5549_s16 = scalar_lea.sflag [#allocation3], %s161_s6 }
  0x8c   : > { %3786 = vmatmul.mubr.msk.bf16.gmra.mrb[8].mxu1 %vm662_vm3, %v5189_v53  ;;  %3938 = vmatmul.mubr.msk.bf16.gmra.mrb[24].mxu0 %vm662_vm3, %v5191_v44  ;;  %s5541_s19 = scalar_lea.hbm %s5593_s3, %s3492_s9 }
  0x8d   : > { %3789 = vmatprep.mubr.msk.bf16.mxu1 %vm662_vm3, %v5195_v8  ;;  %3941 = vmatprep.mubr.msk.bf16.mxu0 %vm662_vm3, %v5201_v1 }
  0x94   : > { %3790 = vmatmul.mubr.msk.bf16.gmra.mrb[12].mxu1 %vm662_vm3, %v5218_v40  ;;  %3942 = vmatmul.mubr.msk.bf16.gmra.mrb[28].mxu0 %vm662_vm3, %v5220_v19 }
  0x95   : > { %3793 = vmatprep.mubr.msk.bf16.mxu1 %vm662_vm3, %v5114_v22  ;;  %3947 = vmatprep.mubr.msk.bf16.mxu0 %vm662_vm3, %v5082_v47 }
  0x9c   : > { %3794 = vmatmul.mubr.msk.bf16.gmra.mrb[16].mxu1 %vm662_vm3, %v5124_v57  ;;  %3948 = vmatmul.mubr.msk.bf16.vlgmr.msra.gmra.mrb[0].mxu0 %vm662_vm3, %v5108_v23 }
  0x9d   : > { %3980 = vmatpush3.bf16.msra.mxu0 %v2478_v7  ;;  %3797 = vmatprep.mubr.msk.bf16.mxu1 %vm662_vm3, %v5133_v5  ;;  %v5669_v7 = vld [vmem:[#allocation21_spill] sm:$0xff] }
  0x9e   : > { %3951 = vmatprep.mubr.msk.bf16.mxu0 %vm662_vm3, %v5153_v56  ;;  %4314 = vmatprep.subr.msk.bf16.mxu0 %vm711_vm0, %v3404_v60  ;;  %v2446_v60 = vshrl.u32 %v5315_v24, 16 }
  0xa4   : > { %3798 = vmatmul.mubr.msk.bf16.gmra.mrb[20].mxu1 %vm662_vm3, %v5137_v49  ;;  %3952 = vmatmul.mubr.msk.bf16.gmra.mrb[4].mxu0 %vm662_vm3, %v5189_v53 }
  0xa5   : > { %3801 = vmatprep.mubr.msk.bf16.mxu1 %vm662_vm3, %v5141_v54  ;;  %3955 = vmatprep.mubr.msk.bf16.mxu0 %vm662_vm3, %v5195_v8 }
  0xac   : > { %3802 = vmatmul.mubr.msk.bf16.gmra.mrb[24].mxu1 %vm662_vm3, %v5145_v36  ;;  %3956 = vmatmul.mubr.msk.bf16.gmra.mrb[8].mxu0 %vm662_vm3, %v5218_v40 }
  0xad   : > { %3805 = vmatprep.mubr.msk.bf16.mxu1 %vm662_vm3, %v5149_v45  ;;  %3959 = vmatprep.mubr.msk.bf16.mxu0 %vm662_vm3, %v5114_v22 }
  0xb4   : > { %3806 = vmatmul.mubr.msk.bf16.gmra.mrb[28].mxu1 %vm662_vm3, %v5159_v29  ;;  %3960 = vmatmul.mubr.msk.bf16.gmra.mrb[12].mxu0 %vm662_vm3, %v5124_v57 }
  0xb5   : > { %3811 = vmatprep.mubr.msk.bf16.mxu1 %vm662_vm3, %v3280_v59  ;;  %3963 = vmatprep.mubr.msk.bf16.mxu0 %vm662_vm3, %v5133_v5 }
  0xbc   : > { %3812 = vmatmul.mubr.msk.bf16.vlgmr.msra.gmra.mrb[0].mxu1 %vm662_vm3, %v5654_v48  ;;  %3964 = vmatmul.mubr.msk.bf16.gmra.mrb[16].mxu0 %vm662_vm3, %v5137_v49 }
  0xbd   : > { %3844 = vmatpush3.bf16.msra.mxu1 %v1604_v35  ;;  %3815 = vmatprep.mubr.msk.bf16.mxu1 %vm662_vm3, %v5655_v52  ;;  %v2465_v35 = vshll.u32 %v223_v55, 16 }
  0xbe   : > { %3967 = vmatprep.mubr.msk.bf16.mxu0 %vm662_vm3, %v5141_v54  ;;  %4310 = vmatprep.subr.msk.bf16.mxu1 %vm711_vm0, %v4378_v2 }
  0xc4   : > { %3816 = vmatmul.mubr.msk.bf16.gmra.mrb[4].mxu1 %vm662_vm3, %v5656_v3  ;;  %3968 = vmatmul.mubr.msk.bf16.gmra.mrb[20].mxu0 %vm662_vm3, %v5145_v36 }
  0xc5   : > { %3819 = vmatprep.mubr.msk.bf16.mxu1 %vm662_vm3, %v5657_v4  ;;  %3971 = vmatprep.mubr.msk.bf16.mxu0 %vm662_vm3, %v5149_v45 }
  0xcc   : > { %3820 = vmatmul.mubr.msk.bf16.gmra.mrb[8].mxu1 %vm662_vm3, %v5658_v21  ;;  %3972 = vmatmul.mubr.msk.bf16.gmra.mrb[24].mxu0 %vm662_vm3, %v5159_v29 }
  0xcd   : > { %3823 = vmatprep.mubr.msk.bf16.mxu1 %vm662_vm3, %v5659_v13  ;;  %3975 = vmatprep.mubr.msk.bf16.mxu0 %vm662_vm3, %v5304_v11 }
  0xd4   : > { %3824 = vmatmul.mubr.msk.bf16.gmra.mrb[12].mxu1 %vm662_vm3, %v5019_v37  ;;  %3976 = vmatmul.mubr.msk.bf16.gmra.mrb[28].mxu0 %vm662_vm3, %v3368_v61  ;;  %v2467_v61 = vrot.slane %v2465_v35, 5 }
  0xd5   : > { %3827 = vmatprep.mubr.msk.bf16.mxu1 %vm662_vm3, %v5050_v41  ;;  %3981 = vmatprep.mubr.msk.bf16.mxu0 %vm662_vm3, %v5660_v17 }
  0xdc   : > { %3828 = vmatmul.mubr.msk.bf16.gmra.mrb[16].mxu1 %vm662_vm3, %v5054_v50  ;;  %3982 = vmatmul.mubr.msk.bf16.vlgmr.msra.gmra.mrb[0].mxu0 %vm662_vm3, %v5661_v51 }
  0xdd   : > { %4014 = vmatpush3.bf16.msra.mxu0 %v2690_v10  ;;  %3831 = vmatprep.mubr.msk.bf16.mxu1 %vm662_vm3, %v5076_v20 }
  0xde   : > { %3985 = vmatprep.mubr.msk.bf16.mxu0 %vm662_vm3, %v5662_v33 }
  0xe4   : > { %3832 = vmatmul.mubr.msk.bf16.gmra.mrb[20].mxu1 %vm662_vm3, %v5087_v0  ;;  %3986 = vmatmul.mubr.msk.bf16.gmra.mrb[4].mxu0 %vm662_vm3, %v5663_v39 }
  0xe5   : > { %3835 = vmatprep.mubr.msk.bf16.mxu1 %vm662_vm3, %v5128_v62  ;;  %3989 = vmatprep.mubr.msk.bf16.mxu0 %vm662_vm3, %v5664_v58 }
  0xec   : > { %3836 = vmatmul.mubr.msk.bf16.gmra.mrb[24].mxu1 %vm662_vm3, %v5155_v31  ;;  %3990 = vmatmul.mubr.msk.bf16.gmra.mrb[8].mxu0 %vm662_vm3, %v5665_v42 }
  0xed   : > { %3839 = vmatprep.mubr.msk.bf16.mxu1 %vm662_vm3, %v5191_v44  ;;  %3993 = vmatprep.mubr.msk.bf16.mxu0 %vm662_vm3, %v5666_v15 }
  0xf4   : > { %3840 = vmatmul.mubr.msk.bf16.gmra.mrb[28].mxu1 %vm662_vm3, %v5201_v1  ;;  %3994 = vmatmul.mubr.msk.bf16.gmra.mrb[12].mxu0 %vm662_vm3, %v5667_v27 }
  0xf5   : > { %3845 = vmatprep.mubr.msk.bf16.mxu1 %vm662_vm3, %v4593_v38  ;;  %3997 = vmatprep.mubr.msk.bf16.mxu0 %vm662_vm3, %v5668_v6  ;;  %v2455_v38 = vshll.u32 %v5318_v9, 16 }
  0xf7   : > { %v2457_v18 = vrot.slane %v2455_v38, 5 }
  0xf9   : > { %v2462_v59 = vor.u32 %v2461_v43, %v2457_v18 }
  0xfb   : > { %v2463_v2 = vrot.slane %v2462_v59, 4 }
  0xfc   : > { %3846 = vmatmul.mubr.msk.bf16.vlgmr.msra.gmra.mrb[0].mxu1 %vm662_vm3, %v5082_v47  ;;  %3998 = vmatmul.mubr.msk.bf16.gmra.mrb[16].mxu0 %vm662_vm3, %v5669_v7  ;;  %v2448_v47 = vrot.slane %v2446_v60, 4 }
  0xfd   : > { %4048 = vmatpush3.bf16.msra.mxu1 %v5670_v25  ;;  %3849 = vmatprep.mubr.msk.bf16.mxu1 %vm662_vm3, %v5108_v23 }
  0xfe   : > { %4001 = vmatprep.mubr.msk.bf16.mxu0 %vm662_vm3, %v5671_v46  ;;  %v2452_v23 = vor.u32 %v2451_v32, %v2448_v47 }
 0x100   : > { %v2453_v48 = vrot.slane %v2452_v23, 4 }
 0x104   : > { %3850 = vmatmul.mubr.msk.bf16.gmra.mrb[4].mxu1 %vm662_vm3, %v5153_v56  ;;  %4002 = vmatmul.mubr.msk.bf16.gmra.mrb[20].mxu0 %vm662_vm3, %v5672_v12  ;;  %v2458_v56 = vsel %vm4587_vm4, %v2453_v48, %v2457_v18 }
 0x105   : > { %3853 = vmatprep.mubr.msk.bf16.mxu1 %vm662_vm3, %v5189_v53  ;;  %4005 = vmatprep.mubr.msk.bf16.mxu0 %vm662_vm3, %v5021_v30  ;;  %v2468_v53 = vsel %vm4587_vm4, %v2463_v2, %v2467_v61 }
 0x106   : > { %v3386_v17 = vcombine.low %v2458_v56, %v2468_v53 }
 0x10c   : > { %3854 = vmatmul.mubr.msk.bf16.gmra.mrb[8].mxu1 %vm662_vm3, %v5195_v8  ;;  %4006 = vmatmul.mubr.msk.bf16.gmra.mrb[24].mxu0 %vm662_vm3, %v5048_v63 }
 0x10d   : > { %3857 = vmatprep.mubr.msk.bf16.mxu1 %vm662_vm3, %v5218_v40  ;;  %4009 = vmatprep.mubr.msk.bf16.mxu0 %vm662_vm3, %v5226_v16 }
 0x114   : > { %3858 = vmatmul.mubr.msk.bf16.gmra.mrb[12].mxu1 %vm662_vm3, %v5114_v22  ;;  %4010 = vmatmul.mubr.msk.bf16.gmra.mrb[28].mxu0 %vm662_vm3, %v3386_v17 }
 0x115   : > { %3861 = vmatprep.mubr.msk.bf16.mxu1 %vm662_vm3, %v5124_v57  ;;  %4015 = vmatprep.mubr.msk.bf16.mxu0 %vm662_vm3, %v5655_v52 }
 0x11c   : > { %3862 = vmatmul.mubr.msk.bf16.gmra.mrb[16].mxu1 %vm662_vm3, %v5133_v5  ;;  %4016 = vmatmul.mubr.msk.bf16.vlgmr.msra.gmra.mrb[0].mxu0 %vm662_vm3, %v5656_v3 }
 0x11d   : > { %3865 = vmatprep.mubr.msk.bf16.mxu1 %vm662_vm3, %v5137_v49  ;;  %4019 = vmatprep.mubr.msk.bf16.mxu0 %vm662_vm3, %v5657_v4 }
 0x124   : > { %3866 = vmatmul.mubr.msk.bf16.gmra.mrb[20].mxu1 %vm662_vm3, %v5141_v54  ;;  %4020 = vmatmul.mubr.msk.bf16.gmra.mrb[4].mxu0 %vm662_vm3, %v5658_v21 }
 0x125   : > { %3869 = vmatprep.mubr.msk.bf16.mxu1 %vm662_vm3, %v5145_v36  ;;  %4023 = vmatprep.mubr.msk.bf16.mxu0 %vm662_vm3, %v5659_v13 }
 0x12c   : > { %3870 = vmatmul.mubr.msk.bf16.gmra.mrb[24].mxu1 %vm662_vm3, %v5149_v45  ;;  %4024 = vmatmul.mubr.msk.bf16.gmra.mrb[8].mxu0 %vm662_vm3, %v5019_v37  ;;  %v3403_v37 = vrot.slane %v5315_v24, 9 }
 0x12d   : > { %3873 = vmatprep.mubr.msk.bf16.mxu1 %vm662_vm3, %v5159_v29  ;;  %4027 = vmatprep.mubr.msk.bf16.mxu0 %vm662_vm3, %v5050_v41  ;;  %v2678_v41 = vrot.slane %v2676_v34, 4 }
 0x134   : > { %3874 = vmatmul.mubr.msk.bf16.gmra.mrb[28].mxu1 %vm662_vm3, %v5304_v11  ;;  %4028 = vmatmul.mubr.msk.bf16.gmra.mrb[12].mxu0 %vm662_vm3, %v5054_v50  ;;  %v2679_v50 = vrot.slane %v223_v55, 5 }
 0x135   : > { %3895 = vmatprep.mubr.msk.bf16.mxu1 %vm662_vm3, %v5667_v27  ;;  %4031 = vmatprep.mubr.msk.bf16.mxu0 %vm662_vm3, %v5076_v20  ;;  %v2677_v20 = vsel %vm4768_vm7, %v3403_v37, %v2676_v34 }
 0x13c   : > { %3896 = vmatmul.mubr.msk.bf16.vlgmr.msra.gmra.mrb[16].mxu1 %vm662_vm3, %v5668_v6  ;;  %4032 = vmatmul.mubr.msk.bf16.gmra.mrb[16].mxu0 %vm662_vm3, %v5087_v0  ;;  %v2680_v0 = vsel %vm4768_vm7, %v2678_v41, %v2679_v50 }
 0x13d   : > { %3899 = vmatprep.mubr.msk.bf16.mxu1 %vm662_vm3, %v5669_v7  ;;  %4035 = vmatprep.mubr.msk.bf16.mxu0 %vm662_vm3, %v5128_v62  ;;  %v3405_v22 = vcombine.low %v2677_v20, %v2680_v0 }
 0x144   : > { %3900 = vmatmul.mubr.msk.bf16.gmra.mrb[20].mxu1 %vm662_vm3, %v5671_v46  ;;  %4036 = vmatmul.mubr.msk.bf16.gmra.mrb[20].mxu0 %vm662_vm3, %v5155_v31 }
 0x145   : > { %3903 = vmatprep.mubr.msk.bf16.mxu1 %vm662_vm3, %v5672_v12  ;;  %4039 = vmatprep.mubr.msk.bf16.mxu0 %vm662_vm3, %v5191_v44 }
 0x14c   : > { %3904 = vmatmul.mubr.msk.bf16.gmra.mrb[24].mxu1 %vm662_vm3, %v5021_v30  ;;  %4040 = vmatmul.mubr.msk.bf16.gmra.mrb[24].mxu0 %vm662_vm3, %v5201_v1 }
 0x14d   : > { %3907 = vmatprep.mubr.msk.bf16.mxu1 %vm662_vm3, %v5048_v63  ;;  %4043 = vmatprep.mubr.msk.bf16.mxu0 %vm662_vm3, %v5220_v19 }
 0x154   : > { %3908 = vmatmul.mubr.msk.bf16.gmra.mrb[28].mxu1 %vm662_vm3, %v5226_v16  ;;  %4044 = vmatmul.mubr.msk.bf16.gmra.mrb[28].mxu0 %vm662_vm3, %v3405_v22  ;;  %v5479_v16 = vld [vmem:[%s5592_s2] ss:$0 sm:$0xff] }
 0x1cf   : > { %v3847_v30 = vpop.f32.mrb[0].mxu1 }
 0x1d0   : > { %v1640_v57 = vpop.f32.mrb[1].mxu1 }
 0x1d1   : > { %v3848_v62 = vpop.f32.mrb[2].mxu1 }
 0x1d2   : > { %v1643_v5 = vpop.f32.mrb[3].mxu1 }
 0x1d7   : > { %v3851_v63 = vpop.f32.mrb[4].mxu1 }
 0x1d8   : > { %v1656_v49 = vpop.f32.mrb[5].mxu1 }
 0x1d9   : > { %v3852_v54 = vpop.f32.mrb[6].mxu1 }
 0x1da   : > { %v1659_v36 = vpop.f32.mrb[7].mxu1 }
 0x1df   : > { %v3855_v45 = vpop.f32.mrb[8].mxu1 }
 0x1e0   : > { %v1672_v31 = vpop.f32.mrb[9].mxu1 }
 0x1e1   : > { %v3856_v29 = vpop.f32.mrb[10].mxu1 }
 0x1e2   : > { %v1675_v26 = vpop.f32.mrb[11].mxu1 }
 0x1e7   : > { %v5468_v44 = vpop.f32.mrb[12].mxu1 }
 0x1e8   : > { %v5470_v8 = vpop.f32.mrb[13].mxu1 }
 0x1e9   : > { %v5472_v1 = vpop.f32.mrb[14].mxu1 }
 0x1ea   : > { %v5474_v40 = vpop.f32.mrb[15].mxu1 }
 0x1ef   : > { %v4017_v19 = vpop.f32.mrb[0].mxu0 }
 0x1f0   : > { %v4049_v52 = vadd.f32 %v4017_v19, %v3847_v30  ;;  %v2726_v3 = vpop.f32.mrb[1].mxu0 }
 0x1f1   : > { %v4050_v4 = vadd.f32 %v2726_v3, %v1640_v57  ;;  %v4018_v11 = vpop.f32.mrb[2].mxu0 }
 0x1f2   : > { %v2894_v21 = vadd.f32 %v4049_v52, %v5479_v16  ;;  %v4051_v13 = vadd.f32 %v4018_v11, %v3848_v62  ;;  %v2729_v24 = vpop.f32.mrb[3].mxu0 }
 0x1f3   : > { %v2892_v9 = vadd.f32 %v4050_v4, %v5479_v16  ;;  %v4052_v10 = vadd.f32 %v2729_v24, %v1643_v5 }
 0x1f4   : > { %v2895_v51 = vadd.f32 %v4051_v13, %v5479_v16  ;;  %v2926_v39 = vmax.f32 %v2894_v21, 0.0 }
 0x1f5   : > { %v2893_v33 = vadd.f32 %v4052_v10, %v5479_v16  ;;  %v2924_v42 = vmax.f32 %v2892_v9, 0.0 }
 0x1f6   : > { %v2927_v58 = vmax.f32 %v2895_v51, 0.0 }
 0x1f7   : > { %v2925_v15 = vmax.f32 %v2893_v33, 0.0  ;;  %v4021_v27 = vpop.f32.mrb[4].mxu0 }
 0x1f8   : > { %v3501_v6 = vpack.c.bf16 %v2927_v58, %v2926_v39  ;;  %v4053_v7 = vadd.f32 %v4021_v27, %v3851_v63  ;;  %v2742_v60 = vpop.f32.mrb[5].mxu0 }
 0x1f9   : > { %v3496_v14 = vpack.c.bf16 %v2925_v15, %v2924_v42  ;;  %v4054_v28 = vadd.f32 %v2742_v60, %v1656_v49  ;;  %v4022_v25 = vpop.f32.mrb[6].mxu0 }
 0x1fa   : > { %3573 = vst [vmem:[%s5488_s8 + $0x8] sm:$0xff] %v3501_v6   ;;  %v2898_v38 = vadd.f32 %v4053_v7, %v5479_v16  ;;  %v4055_v46 = vadd.f32 %v4022_v25, %v3852_v54  ;;  %v2745_v47 = vpop.f32.mrb[7].mxu0 }
 0x1fb   : > { %3497 = vst [vmem:[%s5488_s8] sm:$0xff] %v3496_v14   ;;  %v2896_v32 = vadd.f32 %v4054_v28, %v5479_v16  ;;  %v4056_v18 = vadd.f32 %v2745_v47, %v1659_v36 }
 0x1fc   : > { %v2899_v43 = vadd.f32 %v4055_v46, %v5479_v16  ;;  %v2930_v12 = vmax.f32 %v2898_v38, 0.0 }
 0x1fd   : > { %v2897_v55 = vadd.f32 %v4056_v18, %v5479_v16  ;;  %v2928_v59 = vmax.f32 %v2896_v32, 0.0 }
 0x1fe   : > { %v2931_v23 = vmax.f32 %v2899_v43, 0.0 }
 0x1ff   : > { %v2929_v35 = vmax.f32 %v2897_v55, 0.0  ;;  %v4025_v48 = vpop.f32.mrb[8].mxu0 }
 0x200   : > { %v3511_v2 = vpack.c.bf16 %v2931_v23, %v2930_v12  ;;  %v4057_v61 = vadd.f32 %v4025_v48, %v3855_v45  ;;  %v2758_v56 = vpop.f32.mrb[9].mxu0 }
 0x201   : > { %v3506_v53 = vpack.c.bf16 %v2929_v35, %v2928_v59  ;;  %v4058_v17 = vadd.f32 %v2758_v56, %v1672_v31  ;;  %v4026_v34 = vpop.f32.mrb[10].mxu0 }
 0x202   : > { %3575 = vst [vmem:[%s5488_s8 + $0x18] sm:$0xff] %v3511_v2   ;;  %v2902_v37 = vadd.f32 %v4057_v61, %v5479_v16  ;;  %v4059_v41 = vadd.f32 %v4026_v34, %v3856_v29  ;;  %v2761_v50 = vpop.f32.mrb[11].mxu0 }
 0x203   : > { %3574 = vst [vmem:[%s5488_s8 + $0x10] sm:$0xff] %v3506_v53   ;;  %v2900_v20 = vadd.f32 %v4058_v17, %v5479_v16  ;;  %v4060_v0 = vadd.f32 %v2761_v50, %v1675_v26 }
 0x204   : > { %v2903_v22 = vadd.f32 %v4059_v41, %v5479_v16  ;;  %v2934_v57 = vmax.f32 %v2902_v37, 0.0 }
 0x205   : > { %v2901_v30 = vadd.f32 %v4060_v0, %v5479_v16  ;;  %v2932_v5 = vmax.f32 %v2900_v20, 0.0 }
 0x206   : > { %v2935_v62 = vmax.f32 %v2903_v22, 0.0 }
 0x207   : > { %v2933_v63 = vmax.f32 %v2901_v30, 0.0  ;;  %v4029_v49 = vpop.f32.mrb[12].mxu0 }
 0x208   : > { %v3521_v54 = vpack.c.bf16 %v2935_v62, %v2934_v57  ;;  %v4061_v36 = vadd.f32 %v4029_v49, %v5468_v44  ;;  %v2774_v45 = vpop.f32.mrb[13].mxu0 }
 0x209   : > { %v3516_v31 = vpack.c.bf16 %v2933_v63, %v2932_v5  ;;  %v4062_v29 = vadd.f32 %v2774_v45, %v5470_v8  ;;  %v4030_v19 = vpop.f32.mrb[14].mxu0 }
 0x20a   : > { %3577 = vst [vmem:[%s5488_s8 + $0x28] sm:$0xff] %v3521_v54   ;;  %v2906_v26 = vadd.f32 %v4061_v36, %v5479_v16  ;;  %v4063_v52 = vadd.f32 %v4030_v19, %v5472_v1  ;;  %v2777_v3 = vpop.f32.mrb[15].mxu0 }
 0x20b   : > { %3576 = vst [vmem:[%s5488_s8 + $0x20] sm:$0xff] %v3516_v31   ;;  %v2904_v4 = vadd.f32 %v4062_v29, %v5479_v16  ;;  %v4064_v11 = vadd.f32 %v2777_v3, %v5474_v40 }
 0x20c   : > { %v2907_v21 = vadd.f32 %v4063_v52, %v5479_v16  ;;  %v2938_v13 = vmax.f32 %v2906_v26, 0.0 }
 0x20d   : > { %v2905_v44 = vadd.f32 %v4064_v11, %v5479_v16  ;;  %v2936_v8 = vmax.f32 %v2904_v4, 0.0 }
 0x20e   : > { %v2939_v24 = vmax.f32 %v2907_v21, 0.0 }
 0x20f   : > { %v2937_v9 = vmax.f32 %v2905_v44, 0.0  ;;  %v3897_v10 = vpop.f32.mrb[16].mxu1  ;;  %v4033_v51 = vpop.f32.mrb[16].mxu0 }
 0x210   : > { %v3531_v33 = vpack.c.bf16 %v2939_v24, %v2938_v13  ;;  %v4065_v1 = vadd.f32 %v4033_v51, %v3897_v10  ;;  %v1932_v39 = vpop.f32.mrb[17].mxu1  ;;  %v2790_v58 = vpop.f32.mrb[17].mxu0 }
 0x211   : > { %v3526_v42 = vpack.c.bf16 %v2937_v9, %v2936_v8  ;;  %v4066_v15 = vadd.f32 %v2790_v58, %v1932_v39  ;;  %v3898_v27 = vpop.f32.mrb[18].mxu1  ;;  %v4034_v40 = vpop.f32.mrb[18].mxu0 }
 0x212   : > { %3579 = vst [vmem:[%s5488_s8 + $0x38] sm:$0xff] %v3531_v33   ;;  %v2910_v6 = vadd.f32 %v4065_v1, %v5479_v16  ;;  %v4067_v7 = vadd.f32 %v4034_v40, %v3898_v27  ;;  %v1935_v60 = vpop.f32.mrb[19].mxu1  ;;  %v2793_v14 = vpop.f32.mrb[19].mxu0 }
 0x213   : > { %3578 = vst [vmem:[%s5488_s8 + $0x30] sm:$0xff] %v3526_v42   ;;  %v2908_v28 = vadd.f32 %v4066_v15, %v5479_v16  ;;  %v4068_v25 = vadd.f32 %v2793_v14, %v1935_v60 }
 0x214   : > { %v2911_v38 = vadd.f32 %v4067_v7, %v5479_v16  ;;  %v2942_v47 = vmax.f32 %v2910_v6, 0.0 }
 0x215   : > { %v2909_v46 = vadd.f32 %v4068_v25, %v5479_v16  ;;  %v2940_v18 = vmax.f32 %v2908_v28, 0.0 }
 0x216   : > { %v2943_v32 = vmax.f32 %v2911_v38, 0.0 }
 0x217   : > { %v2941_v43 = vmax.f32 %v2909_v46, 0.0  ;;  %v3901_v55 = vpop.f32.mrb[20].mxu1  ;;  %v4037_v12 = vpop.f32.mrb[20].mxu0 }
 0x218   : > { %v3541_v23 = vpack.c.bf16 %v2943_v32, %v2942_v47  ;;  %v4069_v59 = vadd.f32 %v4037_v12, %v3901_v55  ;;  %v1948_v35 = vpop.f32.mrb[21].mxu1  ;;  %v2806_v48 = vpop.f32.mrb[21].mxu0 }
 0x219   : > { %v3536_v2 = vpack.c.bf16 %v2941_v43, %v2940_v18  ;;  %v4070_v61 = vadd.f32 %v2806_v48, %v1948_v35  ;;  %v3902_v56 = vpop.f32.mrb[22].mxu1  ;;  %v4038_v53 = vpop.f32.mrb[22].mxu0 }
 0x21a   : > { %3581 = vst [vmem:[%s5488_s8 + $0x48] sm:$0xff] %v3541_v23   ;;  %v2914_v17 = vadd.f32 %v4069_v59, %v5479_v16  ;;  %v4071_v34 = vadd.f32 %v4038_v53, %v3902_v56  ;;  %v1951_v37 = vpop.f32.mrb[23].mxu1  ;;  %v2809_v41 = vpop.f32.mrb[23].mxu0 }
 0x21b   : > { %3580 = vst [vmem:[%s5488_s8 + $0x40] sm:$0xff] %v3536_v2   ;;  %v2912_v50 = vadd.f32 %v4070_v61, %v5479_v16  ;;  %v4072_v20 = vadd.f32 %v2809_v41, %v1951_v37 }
 0x21c   : > { %v2915_v0 = vadd.f32 %v4071_v34, %v5479_v16  ;;  %v2946_v30 = vmax.f32 %v2914_v17, 0.0 }
 0x21d   : > { %v2913_v22 = vadd.f32 %v4072_v20, %v5479_v16  ;;  %v2944_v62 = vmax.f32 %v2912_v50, 0.0 }
 0x21e   : > { %v2947_v57 = vmax.f32 %v2915_v0, 0.0 }
 0x21f   : > { %v2945_v5 = vmax.f32 %v2913_v22, 0.0  ;;  %v3905_v63 = vpop.f32.mrb[24].mxu1  ;;  %v4041_v49 = vpop.f32.mrb[24].mxu0 }
 0x220   : > { %v3551_v54 = vpack.c.bf16 %v2947_v57, %v2946_v30  ;;  %v4073_v36 = vadd.f32 %v4041_v49, %v3905_v63  ;;  %v1964_v45 = vpop.f32.mrb[25].mxu1  ;;  %v2822_v31 = vpop.f32.mrb[25].mxu0 }
 0x221   : > { %v3546_v29 = vpack.c.bf16 %v2945_v5, %v2944_v62  ;;  %v4074_v19 = vadd.f32 %v2822_v31, %v1964_v45  ;;  %v3906_v26 = vpop.f32.mrb[26].mxu1  ;;  %v4042_v52 = vpop.f32.mrb[26].mxu0 }
 0x222   : > { %3583 = vst [vmem:[%s5488_s8 + $0x58] sm:$0xff] %v3551_v54   ;;  %v2918_v3 = vadd.f32 %v4073_v36, %v5479_v16  ;;  %v4075_v4 = vadd.f32 %v4042_v52, %v3906_v26  ;;  %v1967_v11 = vpop.f32.mrb[27].mxu1  ;;  %v2825_v21 = vpop.f32.mrb[27].mxu0 }
 0x223   : > { %3582 = vst [vmem:[%s5488_s8 + $0x50] sm:$0xff] %v3546_v29   ;;  %v2916_v44 = vadd.f32 %v4074_v19, %v5479_v16  ;;  %v4076_v13 = vadd.f32 %v2825_v21, %v1967_v11 }
 0x224   : > { %v2919_v24 = vadd.f32 %v4075_v4, %v5479_v16  ;;  %v2950_v9 = vmax.f32 %v2918_v3, 0.0 }
 0x225   : > { %v2917_v8 = vadd.f32 %v4076_v13, %v5479_v16  ;;  %v2948_v51 = vmax.f32 %v2916_v44, 0.0 }
 0x226   : > { %v2951_v10 = vmax.f32 %v2919_v24, 0.0 }
 0x227   : > { %v2949_v33 = vmax.f32 %v2917_v8, 0.0  ;;  %v3909_v1 = vpop.f32.mrb[28].mxu1  ;;  %v4045_v39 = vpop.f32.mrb[28].mxu0 }
 0x228   : > { %v3561_v58 = vpack.c.bf16 %v2951_v10, %v2950_v9  ;;  %v4077_v42 = vadd.f32 %v4045_v39, %v3909_v1  ;;  %v1980_v15 = vpop.f32.mrb[29].mxu1  ;;  %v2838_v27 = vpop.f32.mrb[29].mxu0 }
 0x229   : > { %v3556_v40 = vpack.c.bf16 %v2949_v33, %v2948_v51  ;;  %v4078_v6 = vadd.f32 %v2838_v27, %v1980_v15  ;;  %v3910_v7 = vpop.f32.mrb[30].mxu1  ;;  %v4046_v60 = vpop.f32.mrb[30].mxu0 }
 0x22a   : > { %3585 = vst [vmem:[%s5488_s8 + $0x68] sm:$0xff] %v3561_v58   ;;  %v2922_v14 = vadd.f32 %v4077_v42, %v5479_v16  ;;  %v4079_v28 = vadd.f32 %v4046_v60, %v3910_v7  ;;  %v1983_v25 = vpop.f32.mrb[31].mxu1  ;;  %v2841_v38 = vpop.f32.mrb[31].mxu0 }
 0x22b   : > { %3584 = vst [vmem:[%s5488_s8 + $0x60] sm:$0xff] %v3556_v40   ;;  %v2920_v46 = vadd.f32 %v4078_v6, %v5479_v16  ;;  %v4080_v47 = vadd.f32 %v2841_v38, %v1983_v25 }
 0x22c   : > { %v2923_v32 = vadd.f32 %v4079_v28, %v5479_v16  ;;  %v2954_v43 = vmax.f32 %v2922_v14, 0.0 }
 0x22d   : > { %v2921_v18 = vadd.f32 %v4080_v47, %v5479_v16  ;;  %v2952_v12 = vmax.f32 %v2920_v46, 0.0 }
 0x22e   : > { %v2955_v55 = vmax.f32 %v2923_v32, 0.0 }
 0x22f   : > { %v2953_v23 = vmax.f32 %v2921_v18, 0.0 }
 0x230   : > { %v3571_v59 = vpack.c.bf16 %v2955_v55, %v2954_v43 }
 0x231   : > { %v3566_v35 = vpack.c.bf16 %v2953_v23, %v2952_v12 }
 0x232   : > { %3587 = vst [vmem:[%s5488_s8 + $0x78] sm:$0xff] %v3571_v59  }
 0x233   : > { %3586 = vst [vmem:[%s5488_s8 + $0x70] sm:$0xff] %v3566_v35  }
 0x234   : > { %4392 = shalt.err (!%p4389_p3)
}
 0x235   : > { %s4393_s27 = scalar_lea.hbm %s5541_s19, 2048  ;;  %s4397_s30 = scalar_lea.hbm %s5593_s3, 4096 }
 0x236   : > { %p4394_p4 = scmp.ne.s32.totalorder %s5541_s19, %s4393_s27  ;;  %p4398_p9 = scmp.lt.u32.totalorder %s5541_s19, %s5593_s3 }
 0x237   : > { %p4399_p10 = scmp.lt.u32.totalorder %s4397_s30, %s4393_s27  ;;  %p4401_p12 = scmp.lt.u32.totalorder %s4393_s27, %s5541_s19 }
 0x238   : > { %p4395_p7 = pnand %p4394_p4, %p4504_p5 }
 0x239   : > { %p4400_p11 = por %p4399_p10, %p4398_p9 }
 0x23a   : > { %p4396_p8 = pneg %p4395_p7 }
 0x23b   : > { %p4402_p13 = por %p4401_p12, %p4400_p11 }
 0x23d   : > { %p4403_p0 = pnand %p4402_p13, %p4396_p8 }
 0x23f   : > { %4406 = shalt.err (!%p4403_p0)
}
 0x240   : > { %s4444_s6 = smov 64   ;;  %s4445_s7 = smov 4  }
 0x241   : > { %4316 = dma.vmem_to_hbm [thread:$0]  (%p4504_p5), %s5543_s10, 2048, %s5541_s19, %s5549_s16, %s4444_s6, %s4444_s6, %s4445_s7  }
 0x242 PF: > { %p4322_p1 = scmp.ge.s32.totalorder %s4441_s15, 2  ;;  %s3145_s8 = sand.u32 1, %s4429_s12  }
 0x243   : > { %s3146_s9 = scalar_lea.sflag [#allocation3], %s3145_s8 }
 0x244   : > { %p4319_p2 = pnand %p4322_p1, %p4508_p6 }
 0x246   : > { %4424 = dma.done.wait (!%p4319_p2), %s3146_s9, 2048  }
 0x247   : > { %4426 = vsyncadd (!%p4319_p2), %s3146_s9, 4294965248  ;;  %p13_p3 = scmp.ge.s32.totalorder %s4491_s18, 4   ;;  %s5673_s12 = smov %s4433_s13 }
 0x248   : > { %s5674_s13 = smov %s4437_s14  ;;  %s5675_s14 = smov %s4502_s21 }
 0x249   : > { %s5676_s15 = smov %s4491_s18  ;;  %15 = sbr.rel (!%p13_p3) target bundleno = 3 (0x3), region = 75 }
 0x250   :  { %3151 = vsyncpa [#allocation3], 1 }
 0x251   :  { %3153 = vsyncpa [#allocation3 + $0x1], 1 }

</bundles_post_ra>
